<compile_context>
chip_gen: v6e
topology: v6e:2x2x1
jax: 0.10.0
libtpu: 0.0.40
codegen_flags: <defaults>
</compile_context>

<pallas_src>
import jax
import jax.numpy as jnp
from jax import lax
from jax.experimental import pallas as pl
from jax.experimental.pallas import tpu as pltpu


def _round_up(x, m):
    return (x + m - 1) // m * m


# ------------------------------- Pallas kernel -------------------------------

def bigru_kernel(gi_f_ref, gi_b_ref, h0_ref, w_ref, bhn_ref,
                 out_f_ref, out_b_ref, hn_ref, hf_sc, hb_sc):
    """One time-chunk of the fused bidirectional GRU recurrence.

    gi_f_ref : (TT, B, 3Hp) bf16  input projections, fwd dir, this chunk
    gi_b_ref : (TT, B, 3Hp) bf16  input projections, bwd dir, REVERSED chunk
    h0_ref   : (2, B, Hp)   f32   initial hidden [fwd, bwd] (lane padded)
    w_ref    : (2, Hp, 3Hp) bf16  recurrent weights per direction
    bhn_ref  : (2, 1, Hp)   f32   n-gate hidden bias per direction
    out_f_ref: (TT, B, Hp)  f32   forward outputs, forward time order
    out_b_ref: (TT, B, Hp)  f32   backward outputs, PROCESSING order
    hn_ref   : (2, B, Hp)   f32   final hidden per direction (written at end)
    hf_sc/hb_sc : (B, Hp)   f32   hidden state carried across grid steps
    """
    i = pl.program_id(0)
    nc = pl.num_programs(0)
    TT = gi_f_ref.shape[0]
    B, Hp = hf_sc.shape

    @pl.when(i == 0)
    def _():
        hf_sc[...] = h0_ref[0]
        hb_sc[...] = h0_ref[1]

    w_f = w_ref[0]                                   # (Hp, 3Hp) bf16, resident
    w_b = w_ref[1]
    bhn_f = jnp.broadcast_to(bhn_ref[0], (B, Hp))    # hoisted out of time loop
    bhn_b = jnp.broadcast_to(bhn_ref[1], (B, Hp))

    def cell(gi_bf16, h, w, bhn):
        # One bf16 MXU push per direction per step, f32 accumulation.
        gh = jnp.dot(h.astype(jnp.bfloat16), w,
                     preferred_element_type=jnp.float32)          # (B, 3Hp)
        gi = gi_bf16.astype(jnp.float32)
        # Gate slabs are Hp(=multiple of 128)-lane aligned -> unmasked slices.
        r = jax.nn.sigmoid(gi[:, :Hp] + gh[:, :Hp])
        z = jax.nn.sigmoid(gi[:, Hp:2 * Hp] + gh[:, Hp:2 * Hp])
        n = jnp.tanh(gi[:, 2 * Hp:] + r * (gh[:, 2 * Hp:] + bhn))
        return (1.0 - z) * n + z * h

    def step(s, carry):
        hf, hb = carry
        hf = cell(gi_f_ref[s], hf, w_f, bhn_f)
        hb = cell(gi_b_ref[TT - 1 - s], hb, w_b, bhn_b)
        # Lane-dense, unmasked, forward-ordered stores; the backward half is
        # stored in processing order and flipped once in the XLA epilogue.
        out_f_ref[s] = hf
        out_b_ref[s] = hb
        return (hf, hb)

    hf_fin, hb_fin = lax.fori_loop(0, TT, step, (hf_sc[...], hb_sc[...]),
                                   unroll=min(TT, 8))
    hf_sc[...] = hf_fin
    hb_sc[...] = hb_fin

    @pl.when(i == nc - 1)
    def _():
        hn_ref[0] = hf_fin
        hn_ref[1] = hb_fin


# ------------------------------ parameter prep -------------------------------

def prepare_bigru_params(params, hidden_size):
    """One-time parameter prep.

    Every gate slab is padded to Hp = round_up(H, 128) lanes so in-kernel gate
    slices and per-step stores are full, unmasked lane tiles (zero padding for
    H that is already a multiple of 128).  b_ih (all gates) and b_hh (r, z)
    are pre-folded into the input-projection bias; only the n-gate hidden bias
    stays in the recurrence (it is multiplied by r).  The padded per-gate
    column layout is baked into the input-projection weights, so the XLA side
    emits gi already in the kernel layout with no concatenate/flip pass.
    """
    H = hidden_size
    Hp = _round_up(H, 128)
    G = 3 * Hp

    def pad_gate_cols(w):                        # (rows, 3H) -> (rows, 3Hp)
        out = jnp.zeros((w.shape[0], G), jnp.float32)
        for g in range(3):
            out = out.at[:, g * Hp:g * Hp + H].set(w[:, g * H:(g + 1) * H])
        return out

    def pad_rows(w):                             # (H, 3Hp) -> (Hp, 3Hp)
        return jnp.zeros((Hp, G), w.dtype).at[:H].set(w)

    def fold_bias(b_ih, b_hh):                   # -> (1, 3Hp)
        b = b_ih + jnp.concatenate(
            [b_hh[:, :2 * H], jnp.zeros((1, H), jnp.float32)], axis=1)
        return pad_gate_cols(b)

    def pad_hn_bias(b_hh):                       # -> (1, Hp)
        return jnp.zeros((1, Hp), jnp.float32).at[:, :H].set(b_hh[:, 2 * H:])

    # Per-direction recurrent weights: the contraction stays Hp wide, so there
    # is no block-diagonal zero work at any H (cf. MXU-tile fusion threshold).
    w_hh = jnp.stack([pad_rows(pad_gate_cols(params["w_hh_f_t"])),
                      pad_rows(pad_gate_cols(params["w_hh_b_t"]))],
                     axis=0).astype(jnp.bfloat16)                 # (2, Hp, 3Hp)

    return {
        "w_in_f": pad_gate_cols(params["w_ih_f_t"]),              # (E, 3Hp)
        "w_in_b": pad_gate_cols(params["w_ih_b_t"]),
        "b_gi_f": fold_bias(params["b_ih_f"], params["b_hh_f"]),  # (1, 3Hp)
        "b_gi_b": fold_bias(params["b_ih_b"], params["b_hh_b"]),
        "w_hh": w_hh,
        "b_hn": jnp.stack([pad_hn_bias(params["b_hh_f"]),
                           pad_hn_bias(params["b_hh_b"])], axis=0),  # (2,1,Hp)
    }


# --------------------------------- forward -----------------------------------

def encoder_bigru_forward(indices, h0, embed_mat, prep, *, time_chunk=None):
    """indices:(B,T) int32, h0:(2,B,H) -> (output:(B,T,2H), hidden:(2,B,H))."""
    H = h0.shape[-1]
    Hp = prep["w_hh"].shape[1]
    G = 3 * Hp
    B, T = indices.shape

    if time_chunk is None:
        time_chunk = next(c for c in (16, 8, 4, 2, 1) if T % c == 0)
    assert T % time_chunk == 0, "sequence length must be a multiple of chunk"
    TT = time_chunk
    nc = T // TT

    # Embedding gather + batched input projections (off the serial recurrence
    # path).  Prep weights already carry the padded gate layout, so the einsum
    # emits gi in kernel layout directly; gi is stored as bf16.
    embedded = jnp.take(embed_mat, indices, axis=0)               # (B, T, E)
    x_tm = jnp.transpose(embedded, (1, 0, 2))                     # (T, B, E)
    gi_f = (jnp.einsum("tbe,eg->tbg", x_tm, prep["w_in_f"],
                       preferred_element_type=jnp.float32)
            + prep["b_gi_f"]).astype(jnp.bfloat16)                # (T, B, 3Hp)
    gi_b = (jnp.einsum("tbe,eg->tbg", x_tm, prep["w_in_b"],
                       preferred_element_type=jnp.float32)
            + prep["b_gi_b"]).astype(jnp.bfloat16)                # (T, B, 3Hp)

    h0_pad = jnp.zeros((2, B, Hp), jnp.float32).at[:, :, :H].set(h0)

    # VMEM budget: double-buffered gi/out chunks + resident weights/state.
    gi_blk = TT * B * G * 2
    out_blk = TT * B * Hp * 4
    resident = 2 * Hp * G * 2 + 3 * (2 * B * Hp * 4) + 2 * Hp * 4
    vmem_est = 2 * 2 * (gi_blk + out_blk) + resident
    vmem_limit = int(min(64 * 1024 * 1024, max(8 * 1024 * 1024, 2 * vmem_est)))

    out_f, out_b_rev, hn_pad = pl.pallas_call(
        bigru_kernel,
        out_shape=[jax.ShapeDtypeStruct((T, B, Hp), jnp.float32),
                   jax.ShapeDtypeStruct((T, B, Hp), jnp.float32),
                   jax.ShapeDtypeStruct((2, B, Hp), jnp.float32)],
        grid_spec=pltpu.PrefetchScalarGridSpec(
            num_scalar_prefetch=0,
            grid=(nc,),
            in_specs=[
                pl.BlockSpec((TT, B, G), lambda i: (i, 0, 0)),           # gi fwd
                pl.BlockSpec((TT, B, G), lambda i: (nc - 1 - i, 0, 0)),  # gi bwd (rev chunks)
                pl.BlockSpec((2, B, Hp), lambda i: (0, 0, 0)),           # h0 (resident)
                pl.BlockSpec((2, Hp, G), lambda i: (0, 0, 0)),           # w_hh (resident)
                pl.BlockSpec((2, 1, Hp), lambda i: (0, 0, 0)),           # b_hn (resident)
            ],
            out_specs=[
                pl.BlockSpec((TT, B, Hp), lambda i: (i, 0, 0)),          # out fwd
                pl.BlockSpec((TT, B, Hp), lambda i: (i, 0, 0)),          # out bwd (proc. order)
                pl.BlockSpec((2, B, Hp), lambda i: (0, 0, 0)),           # h_n (resident)
            ],
            scratch_shapes=[pltpu.VMEM((B, Hp), jnp.float32),
                            pltpu.VMEM((B, Hp), jnp.float32)],
        ),
        compiler_params=pltpu.CompilerParams(
            dimension_semantics=("arbitrary",),   # h carried serially across chunks
            vmem_limit_bytes=vmem_limit),
    )(gi_f, gi_b, h0_pad, prep["w_hh"], prep["b_hn"])

    # XLA epilogue: flip the backward half back to natural time order, drop
    # the lane padding, concatenate, go batch_first.
    out_b = out_b_rev[::-1]
    out_tm = jnp.concatenate([out_f[..., :H], out_b[..., :H]], axis=-1)
    output = jnp.transpose(out_tm, (1, 0, 2))                     # (B, T, 2H)
    h_n = hn_pad[:, :, :H]                                        # (2, B, H)
    return output, h_n


# ----------------------------- pure-JAX reference ----------------------------

def _gru_cell_ref(x, h, w_ih_t, w_hh_t, b_ih, b_hh, H):
    hp = jax.lax.Precision.HIGHEST
    gi = jnp.dot(x, w_ih_t, precision=hp) + b_ih
    gh = jnp.dot(h, w_hh_t, precision=hp) + b_hh
    r = jax.nn.sigmoid(gi[:, :H] + gh[:, :H])
    z = jax.nn.sigmoid(gi[:, H:2 * H] + gh[:, H:2 * H])
    n = jnp.tanh(gi[:, 2 * H:] + r * gh[:, 2 * H:])
    return (1.0 - z) * n + z * h


def reference_forward(indices, h0, embed_mat, params):
    """Pure-JAX f32 reference (lax.scan), matching torch.nn.GRU semantics."""
    embedded = jnp.take(embed_mat, indices, axis=0)
    H = h0.shape[-1]
    x_tm = jnp.transpose(embedded, (1, 0, 2))                     # (T, B, E)

    def step_f(h, x):
        h_new = _gru_cell_ref(x, h, params["w_ih_f_t"], params["w_hh_f_t"],
                              params["b_ih_f"], params["b_hh_f"], H)
        return h_new, h_new

    def step_b(h, x):
        h_new = _gru_cell_ref(x, h, params["w_ih_b_t"], params["w_hh_b_t"],
                              params["b_ih_b"], params["b_hh_b"], H)
        return h_new, h_new

    hN_f, out_f = jax.lax.scan(step_f, h0[0], x_tm)
    hN_b, out_b_rev = jax.lax.scan(step_b, h0[1], x_tm[::-1])
    out_b = out_b_rev[::-1]
    output = jnp.transpose(jnp.concatenate([out_f, out_b], axis=-1), (1, 0, 2))
    h_n = jnp.stack([hN_f, hN_b], axis=0)
    return output, h_n


if __name__ == "__main__":
    vocab, embed_dim, hidden_size = 50, 16, 32
    batch, seq = 4, 8

    key = jax.random.PRNGKey(0)
    keys = jax.random.split(key, 11)
    bound = 1.0 / float(hidden_size) ** 0.5

    def u(k, shape):
        return jax.random.uniform(k, shape, jnp.float32, -bound, bound)

    # Deterministic synthetic parameters (embedding weight_mat and the PyTorch
    # GRU weights weight_ih/hh_l0[_reverse] pre-transposed).
    embed_mat = 0.1 * jax.random.normal(keys[0], (vocab, embed_dim), jnp.float32)
    params = {
        "w_ih_f_t": u(keys[1], (embed_dim, 3 * hidden_size)),
        "w_hh_f_t": u(keys[2], (hidden_size, 3 * hidden_size)),
        "b_ih_f":   u(keys[3], (1, 3 * hidden_size)),
        "b_hh_f":   u(keys[4], (1, 3 * hidden_size)),
        "w_ih_b_t": u(keys[5], (embed_dim, 3 * hidden_size)),
        "w_hh_b_t": u(keys[6], (hidden_size, 3 * hidden_size)),
        "b_ih_b":   u(keys[7], (1, 3 * hidden_size)),
        "b_hh_b":   u(keys[8], (1, 3 * hidden_size)),
    }

    indices = jax.random.randint(keys[9], (batch, seq), 0, vocab, jnp.int32)
    # initHidden() is zeros; use a small non-zero h0 to also exercise the h0
    # plumbing (forward/backward slot ordering).
    h0 = 0.1 * jax.random.normal(keys[10], (2, batch, hidden_size), jnp.float32)

    prep = prepare_bigru_params(params, hidden_size)
    fwd = jax.jit(lambda i, h: encoder_bigru_forward(i, h, embed_mat, prep,
                                                     time_chunk=4))
    output, hidden = fwd(indices, h0)
    jax.block_until_ready((output, hidden))

    ref_out, ref_hid = reference_forward(indices, h0, embed_mat, params)
    assert output.shape == (batch, seq, 2 * hidden_size)
    assert hidden.shape == (2, batch, hidden_size)
    # Kernel uses bf16 gi storage and bf16 matmul inputs (f32 accumulate);
    # the reference is full f32 at HIGHEST precision.
    assert jnp.allclose(output, ref_out, atol=2e-2, rtol=2e-2)
    assert jnp.allclose(hidden, ref_hid, atol=2e-2, rtol=2e-2)

    print("KERNEL_OK")
</pallas_src>

<mosaic_0001>
module attributes {stable_mosaic.version = 11 : i64} {
  func.func @bigru_kernel(%arg0: i32, %arg1: memref<4x4x384xbf16, #tpu.memory_space<vmem>>, %arg2: memref<4x4x384xbf16, #tpu.memory_space<vmem>>, %arg3: memref<2x4x128xf32, #tpu.memory_space<vmem>>, %arg4: memref<2x128x384xbf16, #tpu.memory_space<vmem>>, %arg5: memref<2x1x128xf32, #tpu.memory_space<vmem>>, %arg6: memref<4x4x128xf32, #tpu.memory_space<vmem>>, %arg7: memref<4x4x128xf32, #tpu.memory_space<vmem>>, %arg8: memref<2x4x128xf32, #tpu.memory_space<vmem>>, %arg9: memref<4x128xf32, #tpu.memory_space<vmem>>, %arg10: memref<4x128xf32, #tpu.memory_space<vmem>>) attributes {dimension_semantics = [#tpu.dimension_semantics<arbitrary>], iteration_bounds = array<i64: 2>, scalar_prefetch = 0 : i64, scratch_operands = 2 : i64, tpu.core_type = #tpu.core_type<tc>, window_params = [{transform_indices = @transform_0, window_bounds = array<i64: 4, 4, 384>}, {transform_indices = @transform_1, window_bounds = array<i64: 4, 4, 384>}, {pipeline_mode = #tpu.pipeline_mode<synchronous>, transform_indices = @transform_2, window_bounds = array<i64: 2, 4, 128>}, {pipeline_mode = #tpu.pipeline_mode<synchronous>, transform_indices = @transform_3, window_bounds = array<i64: 2, 128, 384>}, {pipeline_mode = #tpu.pipeline_mode<synchronous>, transform_indices = @transform_4, window_bounds = array<i64: 2, 1, 128>}, {transform_indices = @transform_5, window_bounds = array<i64: 4, 4, 128>}, {transform_indices = @transform_6, window_bounds = array<i64: 4, 4, 128>}, {pipeline_mode = #tpu.pipeline_mode<synchronous>, transform_indices = @transform_7, window_bounds = array<i64: 2, 4, 128>}]} {
    %c0_i32 = arith.constant 0 : i32
    %0 = arith.cmpi eq, %arg0, %c0_i32 : i32
    %1 = arith.extui %0 : i1 to i32
    %c0_i32_0 = arith.constant 0 : i32
    %2 = arith.cmpi ne, %1, %c0_i32_0 : i32
    scf.if %2 {
      %c0_89 = arith.constant 0 : index
      %c0_90 = arith.constant 0 : index
      %c0_91 = arith.constant 0 : index
      %322 = vector.load %arg3[%c0_89, %c0_90, %c0_91] : memref<2x4x128xf32, #tpu.memory_space<vmem>>, vector<1x4x128xf32>
      %323 = vector.shape_cast %322 : vector<1x4x128xf32> to vector<4x128xf32>
      %c0_92 = arith.constant 0 : index
      %c0_93 = arith.constant 0 : index
      %324 = vector.load %arg9[%c0_92, %c0_93] : memref<4x128xf32, #tpu.memory_space<vmem>>, vector<4x128xf32>
      tpu.vector_store %arg9[%c0_92, %c0_93], %323 {strides = array<i32>} : memref<4x128xf32, #tpu.memory_space<vmem>>, vector<4x128xf32>,
      %c1_94 = arith.constant 1 : index
      %c0_95 = arith.constant 0 : index
      %c0_96 = arith.constant 0 : index
      %325 = vector.load %arg3[%c1_94, %c0_95, %c0_96] : memref<2x4x128xf32, #tpu.memory_space<vmem>>, vector<1x4x128xf32>
      %326 = vector.shape_cast %325 : vector<1x4x128xf32> to vector<4x128xf32>
      %c0_97 = arith.constant 0 : index
      %c0_98 = arith.constant 0 : index
      %327 = vector.load %arg10[%c0_97, %c0_98] : memref<4x128xf32, #tpu.memory_space<vmem>>, vector<4x128xf32>
      tpu.vector_store %arg10[%c0_97, %c0_98], %326 {strides = array<i32>} : memref<4x128xf32, #tpu.memory_space<vmem>>, vector<4x128xf32>,
    } else {
    }
    %c0 = arith.constant 0 : index
    %c0_1 = arith.constant 0 : index
    %c0_2 = arith.constant 0 : index
    %3 = vector.load %arg4[%c0, %c0_1, %c0_2] : memref<2x128x384xbf16, #tpu.memory_space<vmem>>, vector<1x128x384xbf16>
    %4 = vector.shape_cast %3 : vector<1x128x384xbf16> to vector<128x384xbf16>
    %c1 = arith.constant 1 : index
    %c0_3 = arith.constant 0 : index
    %c0_4 = arith.constant 0 : index
    %5 = vector.load %arg4[%c1, %c0_3, %c0_4] : memref<2x128x384xbf16, #tpu.memory_space<vmem>>, vector<1x128x384xbf16>
    %6 = vector.shape_cast %5 : vector<1x128x384xbf16> to vector<128x384xbf16>
    %c0_5 = arith.constant 0 : index
    %c0_6 = arith.constant 0 : index
    %c0_7 = arith.constant 0 : index
    %7 = vector.load %arg5[%c0_5, %c0_6, %c0_7] : memref<2x1x128xf32, #tpu.memory_space<vmem>>, vector<1x1x128xf32>
    %8 = vector.shape_cast %7 : vector<1x1x128xf32> to vector<1x128xf32>
    %9 = vector.shape_cast %8 : vector<1x128xf32> to vector<1x128xf32>
    %10 = vector.broadcast %9 : vector<1x128xf32> to vector<4x128xf32>
    %c1_8 = arith.constant 1 : index
    %c0_9 = arith.constant 0 : index
    %c0_10 = arith.constant 0 : index
    %11 = vector.load %arg5[%c1_8, %c0_9, %c0_10] : memref<2x1x128xf32, #tpu.memory_space<vmem>>, vector<1x1x128xf32>
    %12 = vector.shape_cast %11 : vector<1x1x128xf32> to vector<1x128xf32>
    %13 = vector.shape_cast %12 : vector<1x128xf32> to vector<1x128xf32>
    %14 = vector.broadcast %13 : vector<1x128xf32> to vector<4x128xf32>
    %c0_11 = arith.constant 0 : index
    %c0_12 = arith.constant 0 : index
    %15 = vector.load %arg9[%c0_11, %c0_12] : memref<4x128xf32, #tpu.memory_space<vmem>>, vector<4x128xf32>
    %c0_13 = arith.constant 0 : index
    %c0_14 = arith.constant 0 : index
    %16 = vector.load %arg10[%c0_13, %c0_14] : memref<4x128xf32, #tpu.memory_space<vmem>>, vector<4x128xf32>
    %c0_i32_15 = arith.constant 0 : i32
    %17 = arith.index_cast %c0_i32_15 : i32 to index
    %c0_16 = arith.constant 0 : index
    %c0_17 = arith.constant 0 : index
    %18 = vector.load %arg1[%17, %c0_16, %c0_17] : memref<4x4x384xbf16, #tpu.memory_space<vmem>>, vector<1x4x384xbf16>
    %19 = vector.shape_cast %18 : vector<1x4x384xbf16> to vector<4x384xbf16>
    %20 = arith.truncf %15 : vector<4x128xf32> to vector<4x128xbf16>
    %cst = arith.constant dense<0.000000e+00> : vector<4x384xf32>
    %21 = tpu.matmul %20, %4, %cst {dimension_numbers = #tpu.dot_dimension_numbers<[1], [0], [0], [1], [0, 0, 1, 1], [], []>} : vector<4x128xbf16>, vector<128x384xbf16>, vector<4x384xf32> -> vector<4x384xf32>
    %22 = arith.extf %19 : vector<4x384xbf16> to vector<4x384xf32>
    %23 = vector.extract_strided_slice %22 {offsets = [0, 0], sizes = [4, 128], strides = [1, 1]} : vector<4x384xf32> to vector<4x128xf32>
    %24 = vector.extract_strided_slice %21 {offsets = [0, 0], sizes = [4, 128], strides = [1, 1]} : vector<4x384xf32> to vector<4x128xf32>
    %25 = arith.addf %23, %24 : vector<4x128xf32>
    %26 = arith.negf %25 : vector<4x128xf32>
    %27 = math.exp %26 : vector<4x128xf32>
    %cst_18 = arith.constant 1.000000e+00 : f32
    %28 = vector.broadcast %cst_18 : f32 to vector<4x128xf32>
    %29 = arith.addf %28, %27 : vector<4x128xf32>
    %30 = arith.divf %28, %29 : vector<4x128xf32>
    %31 = vector.extract_strided_slice %22 {offsets = [0, 128], sizes = [4, 128], strides = [1, 1]} : vector<4x384xf32> to vector<4x128xf32>
    %32 = vector.extract_strided_slice %21 {offsets = [0, 128], sizes = [4, 128], strides = [1, 1]} : vector<4x384xf32> to vector<4x128xf32>
    %33 = arith.addf %31, %32 : vector<4x128xf32>
    %34 = arith.negf %33 : vector<4x128xf32>
    %35 = math.exp %34 : vector<4x128xf32>
    %cst_19 = arith.constant 1.000000e+00 : f32
    %36 = vector.broadcast %cst_19 : f32 to vector<4x128xf32>
    %37 = arith.addf %36, %35 : vector<4x128xf32>
    %38 = arith.divf %36, %37 : vector<4x128xf32>
    %39 = vector.extract_strided_slice %22 {offsets = [0, 256], sizes = [4, 128], strides = [1, 1]} : vector<4x384xf32> to vector<4x128xf32>
    %40 = vector.extract_strided_slice %21 {offsets = [0, 256], sizes = [4, 128], strides = [1, 1]} : vector<4x384xf32> to vector<4x128xf32>
    %41 = arith.addf %40, %10 : vector<4x128xf32>
    %42 = arith.mulf %30, %41 : vector<4x128xf32>
    %43 = arith.addf %39, %42 : vector<4x128xf32>
    %44 = math.tanh %43 : vector<4x128xf32>
    %cst_20 = arith.constant 1.000000e+00 : f32
    %45 = vector.broadcast %cst_20 : f32 to vector<4x128xf32>
    %46 = arith.subf %45, %38 : vector<4x128xf32>
    %47 = arith.mulf %46, %44 : vector<4x128xf32>
    %48 = arith.mulf %38, %15 : vector<4x128xf32>
    %49 = arith.addf %47, %48 : vector<4x128xf32>
    %c3_i32 = arith.constant 3 : i32
    %50 = arith.subi %c3_i32, %c0_i32_15 : i32
    %51 = arith.index_cast %50 : i32 to index
    %c0_21 = arith.constant 0 : index
    %c0_22 = arith.constant 0 : index
    %52 = vector.load %arg2[%51, %c0_21, %c0_22] : memref<4x4x384xbf16, #tpu.memory_space<vmem>>, vector<1x4x384xbf16>
    %53 = vector.shape_cast %52 : vector<1x4x384xbf16> to vector<4x384xbf16>
    %54 = arith.truncf %16 : vector<4x128xf32> to vector<4x128xbf16>
    %cst_23 = arith.constant dense<0.000000e+00> : vector<4x384xf32>
    %55 = tpu.matmul %54, %6, %cst_23 {dimension_numbers = #tpu.dot_dimension_numbers<[1], [0], [0], [1], [0, 0, 1, 1], [], []>} : vector<4x128xbf16>, vector<128x384xbf16>, vector<4x384xf32> -> vector<4x384xf32>
    %56 = arith.extf %53 : vector<4x384xbf16> to vector<4x384xf32>
    %57 = vector.extract_strided_slice %56 {offsets = [0, 0], sizes = [4, 128], strides = [1, 1]} : vector<4x384xf32> to vector<4x128xf32>
    %58 = vector.extract_strided_slice %55 {offsets = [0, 0], sizes = [4, 128], strides = [1, 1]} : vector<4x384xf32> to vector<4x128xf32>
    %59 = arith.addf %57, %58 : vector<4x128xf32>
    %60 = arith.negf %59 : vector<4x128xf32>
    %61 = math.exp %60 : vector<4x128xf32>
    %cst_24 = arith.constant 1.000000e+00 : f32
    %62 = vector.broadcast %cst_24 : f32 to vector<4x128xf32>
    %63 = arith.addf %62, %61 : vector<4x128xf32>
    %64 = arith.divf %62, %63 : vector<4x128xf32>
    %65 = vector.extract_strided_slice %56 {offsets = [0, 128], sizes = [4, 128], strides = [1, 1]} : vector<4x384xf32> to vector<4x128xf32>
    %66 = vector.extract_strided_slice %55 {offsets = [0, 128], sizes = [4, 128], strides = [1, 1]} : vector<4x384xf32> to vector<4x128xf32>
    %67 = arith.addf %65, %66 : vector<4x128xf32>
    %68 = arith.negf %67 : vector<4x128xf32>
    %69 = math.exp %68 : vector<4x128xf32>
    %cst_25 = arith.constant 1.000000e+00 : f32
    %70 = vector.broadcast %cst_25 : f32 to vector<4x128xf32>
    %71 = arith.addf %70, %69 : vector<4x128xf32>
    %72 = arith.divf %70, %71 : vector<4x128xf32>
    %73 = vector.extract_strided_slice %56 {offsets = [0, 256], sizes = [4, 128], strides = [1, 1]} : vector<4x384xf32> to vector<4x128xf32>
    %74 = vector.extract_strided_slice %55 {offsets = [0, 256], sizes = [4, 128], strides = [1, 1]} : vector<4x384xf32> to vector<4x128xf32>
    %75 = arith.addf %74, %14 : vector<4x128xf32>
    %76 = arith.mulf %64, %75 : vector<4x128xf32>
    %77 = arith.addf %73, %76 : vector<4x128xf32>
    %78 = math.tanh %77 : vector<4x128xf32>
    %cst_26 = arith.constant 1.000000e+00 : f32
    %79 = vector.broadcast %cst_26 : f32 to vector<4x128xf32>
    %80 = arith.subf %79, %72 : vector<4x128xf32>
    %81 = arith.mulf %80, %78 : vector<4x128xf32>
    %82 = arith.mulf %72, %16 : vector<4x128xf32>
    %83 = arith.addf %81, %82 : vector<4x128xf32>
    %84 = arith.index_cast %c0_i32_15 : i32 to index
    %c0_27 = arith.constant 0 : index
    %c0_28 = arith.constant 0 : index
    %85 = vector.load %arg6[%84, %c0_27, %c0_28] : memref<4x4x128xf32, #tpu.memory_space<vmem>>, vector<1x4x128xf32>
    %86 = vector.shape_cast %85 : vector<1x4x128xf32> to vector<4x128xf32>
    %87 = vector.shape_cast %49 : vector<4x128xf32> to vector<1x4x128xf32>
    tpu.vector_store %arg6[%84, %c0_27, %c0_28], %87 {strides = array<i32>} : memref<4x4x128xf32, #tpu.memory_space<vmem>>, vector<1x4x128xf32>,
    %88 = arith.index_cast %c0_i32_15 : i32 to index
    %c0_29 = arith.constant 0 : index
    %c0_30 = arith.constant 0 : index
    %89 = vector.load %arg7[%88, %c0_29, %c0_30] : memref<4x4x128xf32, #tpu.memory_space<vmem>>, vector<1x4x128xf32>
    %90 = vector.shape_cast %89 : vector<1x4x128xf32> to vector<4x128xf32>
    %91 = vector.shape_cast %83 : vector<4x128xf32> to vector<1x4x128xf32>
    tpu.vector_store %arg7[%88, %c0_29, %c0_30], %91 {strides = array<i32>} : memref<4x4x128xf32, #tpu.memory_space<vmem>>, vector<1x4x128xf32>,
    %c1_i32 = arith.constant 1 : i32
    %92 = arith.index_cast %c1_i32 : i32 to index
    %c0_31 = arith.constant 0 : index
    %c0_32 = arith.constant 0 : index
    %93 = vector.load %arg1[%92, %c0_31, %c0_32] : memref<4x4x384xbf16, #tpu.memory_space<vmem>>, vector<1x4x384xbf16>
    %94 = vector.shape_cast %93 : vector<1x4x384xbf16> to vector<4x384xbf16>
    %95 = arith.truncf %49 : vector<4x128xf32> to vector<4x128xbf16>
    %cst_33 = arith.constant dense<0.000000e+00> : vector<4x384xf32>
    %96 = tpu.matmul %95, %4, %cst_33 {dimension_numbers = #tpu.dot_dimension_numbers<[1], [0], [0], [1], [0, 0, 1, 1], [], []>} : vector<4x128xbf16>, vector<128x384xbf16>, vector<4x384xf32> -> vector<4x384xf32>
    %97 = arith.extf %94 : vector<4x384xbf16> to vector<4x384xf32>
    %98 = vector.extract_strided_slice %97 {offsets = [0, 0], sizes = [4, 128], strides = [1, 1]} : vector<4x384xf32> to vector<4x128xf32>
    %99 = vector.extract_strided_slice %96 {offsets = [0, 0], sizes = [4, 128], strides = [1, 1]} : vector<4x384xf32> to vector<4x128xf32>
    %100 = arith.addf %98, %99 : vector<4x128xf32>
    %101 = arith.negf %100 : vector<4x128xf32>
    %102 = math.exp %101 : vector<4x128xf32>
    %cst_34 = arith.constant 1.000000e+00 : f32
    %103 = vector.broadcast %cst_34 : f32 to vector<4x128xf32>
    %104 = arith.addf %103, %102 : vector<4x128xf32>
    %105 = arith.divf %103, %104 : vector<4x128xf32>
    %106 = vector.extract_strided_slice %97 {offsets = [0, 128], sizes = [4, 128], strides = [1, 1]} : vector<4x384xf32> to vector<4x128xf32>
    %107 = vector.extract_strided_slice %96 {offsets = [0, 128], sizes = [4, 128], strides = [1, 1]} : vector<4x384xf32> to vector<4x128xf32>
    %108 = arith.addf %106, %107 : vector<4x128xf32>
    %109 = arith.negf %108 : vector<4x128xf32>
    %110 = math.exp %109 : vector<4x128xf32>
    %cst_35 = arith.constant 1.000000e+00 : f32
    %111 = vector.broadcast %cst_35 : f32 to vector<4x128xf32>
    %112 = arith.addf %111, %110 : vector<4x128xf32>
    %113 = arith.divf %111, %112 : vector<4x128xf32>
    %114 = vector.extract_strided_slice %97 {offsets = [0, 256], sizes = [4, 128], strides = [1, 1]} : vector<4x384xf32> to vector<4x128xf32>
    %115 = vector.extract_strided_slice %96 {offsets = [0, 256], sizes = [4, 128], strides = [1, 1]} : vector<4x384xf32> to vector<4x128xf32>
    %116 = arith.addf %115, %10 : vector<4x128xf32>
    %117 = arith.mulf %105, %116 : vector<4x128xf32>
    %118 = arith.addf %114, %117 : vector<4x128xf32>
    %119 = math.tanh %118 : vector<4x128xf32>
    %cst_36 = arith.constant 1.000000e+00 : f32
    %120 = vector.broadcast %cst_36 : f32 to vector<4x128xf32>
    %121 = arith.subf %120, %113 : vector<4x128xf32>
    %122 = arith.mulf %121, %119 : vector<4x128xf32>
    %123 = arith.mulf %113, %49 : vector<4x128xf32>
    %124 = arith.addf %122, %123 : vector<4x128xf32>
    %c3_i32_37 = arith.constant 3 : i32
    %125 = arith.subi %c3_i32_37, %c1_i32 : i32
    %126 = arith.index_cast %125 : i32 to index
    %c0_38 = arith.constant 0 : index
    %c0_39 = arith.constant 0 : index
    %127 = vector.load %arg2[%126, %c0_38, %c0_39] : memref<4x4x384xbf16, #tpu.memory_space<vmem>>, vector<1x4x384xbf16>
    %128 = vector.shape_cast %127 : vector<1x4x384xbf16> to vector<4x384xbf16>
    %129 = arith.truncf %83 : vector<4x128xf32> to vector<4x128xbf16>
    %cst_40 = arith.constant dense<0.000000e+00> : vector<4x384xf32>
    %130 = tpu.matmul %129, %6, %cst_40 {dimension_numbers = #tpu.dot_dimension_numbers<[1], [0], [0], [1], [0, 0, 1, 1], [], []>} : vector<4x128xbf16>, vector<128x384xbf16>, vector<4x384xf32> -> vector<4x384xf32>
    %131 = arith.extf %128 : vector<4x384xbf16> to vector<4x384xf32>
    %132 = vector.extract_strided_slice %131 {offsets = [0, 0], sizes = [4, 128], strides = [1, 1]} : vector<4x384xf32> to vector<4x128xf32>
    %133 = vector.extract_strided_slice %130 {offsets = [0, 0], sizes = [4, 128], strides = [1, 1]} : vector<4x384xf32> to vector<4x128xf32>
    %134 = arith.addf %132, %133 : vector<4x128xf32>
    %135 = arith.negf %134 : vector<4x128xf32>
    %136 = math.exp %135 : vector<4x128xf32>
    %cst_41 = arith.constant 1.000000e+00 : f32
    %137 = vector.broadcast %cst_41 : f32 to vector<4x128xf32>
    %138 = arith.addf %137, %136 : vector<4x128xf32>
    %139 = arith.divf %137, %138 : vector<4x128xf32>
    %140 = vector.extract_strided_slice %131 {offsets = [0, 128], sizes = [4, 128], strides = [1, 1]} : vector<4x384xf32> to vector<4x128xf32>
    %141 = vector.extract_strided_slice %130 {offsets = [0, 128], sizes = [4, 128], strides = [1, 1]} : vector<4x384xf32> to vector<4x128xf32>
    %142 = arith.addf %140, %141 : vector<4x128xf32>
    %143 = arith.negf %142 : vector<4x128xf32>
    %144 = math.exp %143 : vector<4x128xf32>
    %cst_42 = arith.constant 1.000000e+00 : f32
    %145 = vector.broadcast %cst_42 : f32 to vector<4x128xf32>
    %146 = arith.addf %145, %144 : vector<4x128xf32>
    %147 = arith.divf %145, %146 : vector<4x128xf32>
    %148 = vector.extract_strided_slice %131 {offsets = [0, 256], sizes = [4, 128], strides = [1, 1]} : vector<4x384xf32> to vector<4x128xf32>
    %149 = vector.extract_strided_slice %130 {offsets = [0, 256], sizes = [4, 128], strides = [1, 1]} : vector<4x384xf32> to vector<4x128xf32>
    %150 = arith.addf %149, %14 : vector<4x128xf32>
    %151 = arith.mulf %139, %150 : vector<4x128xf32>
    %152 = arith.addf %148, %151 : vector<4x128xf32>
    %153 = math.tanh %152 : vector<4x128xf32>
    %cst_43 = arith.constant 1.000000e+00 : f32
    %154 = vector.broadcast %cst_43 : f32 to vector<4x128xf32>
    %155 = arith.subf %154, %147 : vector<4x128xf32>
    %156 = arith.mulf %155, %153 : vector<4x128xf32>
    %157 = arith.mulf %147, %83 : vector<4x128xf32>
    %158 = arith.addf %156, %157 : vector<4x128xf32>
    %159 = arith.index_cast %c1_i32 : i32 to index
    %c0_44 = arith.constant 0 : index
    %c0_45 = arith.constant 0 : index
    %160 = vector.load %arg6[%159, %c0_44, %c0_45] : memref<4x4x128xf32, #tpu.memory_space<vmem>>, vector<1x4x128xf32>
    %161 = vector.shape_cast %160 : vector<1x4x128xf32> to vector<4x128xf32>
    %162 = vector.shape_cast %124 : vector<4x128xf32> to vector<1x4x128xf32>
    tpu.vector_store %arg6[%159, %c0_44, %c0_45], %162 {strides = array<i32>} : memref<4x4x128xf32, #tpu.memory_space<vmem>>, vector<1x4x128xf32>,
    %163 = arith.index_cast %c1_i32 : i32 to index
    %c0_46 = arith.constant 0 : index
    %c0_47 = arith.constant 0 : index
    %164 = vector.load %arg7[%163, %c0_46, %c0_47] : memref<4x4x128xf32, #tpu.memory_space<vmem>>, vector<1x4x128xf32>
    %165 = vector.shape_cast %164 : vector<1x4x128xf32> to vector<4x128xf32>
    %166 = vector.shape_cast %158 : vector<4x128xf32> to vector<1x4x128xf32>
    tpu.vector_store %arg7[%163, %c0_46, %c0_47], %166 {strides = array<i32>} : memref<4x4x128xf32, #tpu.memory_space<vmem>>, vector<1x4x128xf32>,
    %c2_i32 = arith.constant 2 : i32
    %167 = arith.index_cast %c2_i32 : i32 to index
    %c0_48 = arith.constant 0 : index
    %c0_49 = arith.constant 0 : index
    %168 = vector.load %arg1[%167, %c0_48, %c0_49] : memref<4x4x384xbf16, #tpu.memory_space<vmem>>, vector<1x4x384xbf16>
    %169 = vector.shape_cast %168 : vector<1x4x384xbf16> to vector<4x384xbf16>
    %170 = arith.truncf %124 : vector<4x128xf32> to vector<4x128xbf16>
    %cst_50 = arith.constant dense<0.000000e+00> : vector<4x384xf32>
    %171 = tpu.matmul %170, %4, %cst_50 {dimension_numbers = #tpu.dot_dimension_numbers<[1], [0], [0], [1], [0, 0, 1, 1], [], []>} : vector<4x128xbf16>, vector<128x384xbf16>, vector<4x384xf32> -> vector<4x384xf32>
    %172 = arith.extf %169 : vector<4x384xbf16> to vector<4x384xf32>
    %173 = vector.extract_strided_slice %172 {offsets = [0, 0], sizes = [4, 128], strides = [1, 1]} : vector<4x384xf32> to vector<4x128xf32>
    %174 = vector.extract_strided_slice %171 {offsets = [0, 0], sizes = [4, 128], strides = [1, 1]} : vector<4x384xf32> to vector<4x128xf32>
    %175 = arith.addf %173, %174 : vector<4x128xf32>
    %176 = arith.negf %175 : vector<4x128xf32>
    %177 = math.exp %176 : vector<4x128xf32>
    %cst_51 = arith.constant 1.000000e+00 : f32
    %178 = vector.broadcast %cst_51 : f32 to vector<4x128xf32>
    %179 = arith.addf %178, %177 : vector<4x128xf32>
    %180 = arith.divf %178, %179 : vector<4x128xf32>
    %181 = vector.extract_strided_slice %172 {offsets = [0, 128], sizes = [4, 128], strides = [1, 1]} : vector<4x384xf32> to vector<4x128xf32>
    %182 = vector.extract_strided_slice %171 {offsets = [0, 128], sizes = [4, 128], strides = [1, 1]} : vector<4x384xf32> to vector<4x128xf32>
    %183 = arith.addf %181, %182 : vector<4x128xf32>
    %184 = arith.negf %183 : vector<4x128xf32>
    %185 = math.exp %184 : vector<4x128xf32>
    %cst_52 = arith.constant 1.000000e+00 : f32
    %186 = vector.broadcast %cst_52 : f32 to vector<4x128xf32>
    %187 = arith.addf %186, %185 : vector<4x128xf32>
    %188 = arith.divf %186, %187 : vector<4x128xf32>
    %189 = vector.extract_strided_slice %172 {offsets = [0, 256], sizes = [4, 128], strides = [1, 1]} : vector<4x384xf32> to vector<4x128xf32>
    %190 = vector.extract_strided_slice %171 {offsets = [0, 256], sizes = [4, 128], strides = [1, 1]} : vector<4x384xf32> to vector<4x128xf32>
    %191 = arith.addf %190, %10 : vector<4x128xf32>
    %192 = arith.mulf %180, %191 : vector<4x128xf32>
    %193 = arith.addf %189, %192 : vector<4x128xf32>
    %194 = math.tanh %193 : vector<4x128xf32>
    %cst_53 = arith.constant 1.000000e+00 : f32
    %195 = vector.broadcast %cst_53 : f32 to vector<4x128xf32>
    %196 = arith.subf %195, %188 : vector<4x128xf32>
    %197 = arith.mulf %196, %194 : vector<4x128xf32>
    %198 = arith.mulf %188, %124 : vector<4x128xf32>
    %199 = arith.addf %197, %198 : vector<4x128xf32>
    %c3_i32_54 = arith.constant 3 : i32
    %200 = arith.subi %c3_i32_54, %c2_i32 : i32
    %201 = arith.index_cast %200 : i32 to index
    %c0_55 = arith.constant 0 : index
    %c0_56 = arith.constant 0 : index
    %202 = vector.load %arg2[%201, %c0_55, %c0_56] : memref<4x4x384xbf16, #tpu.memory_space<vmem>>, vector<1x4x384xbf16>
    %203 = vector.shape_cast %202 : vector<1x4x384xbf16> to vector<4x384xbf16>
    %204 = arith.truncf %158 : vector<4x128xf32> to vector<4x128xbf16>
    %cst_57 = arith.constant dense<0.000000e+00> : vector<4x384xf32>
    %205 = tpu.matmul %204, %6, %cst_57 {dimension_numbers = #tpu.dot_dimension_numbers<[1], [0], [0], [1], [0, 0, 1, 1], [], []>} : vector<4x128xbf16>, vector<128x384xbf16>, vector<4x384xf32> -> vector<4x384xf32>
    %206 = arith.extf %203 : vector<4x384xbf16> to vector<4x384xf32>
    %207 = vector.extract_strided_slice %206 {offsets = [0, 0], sizes = [4, 128], strides = [1, 1]} : vector<4x384xf32> to vector<4x128xf32>
    %208 = vector.extract_strided_slice %205 {offsets = [0, 0], sizes = [4, 128], strides = [1, 1]} : vector<4x384xf32> to vector<4x128xf32>
    %209 = arith.addf %207, %208 : vector<4x128xf32>
    %210 = arith.negf %209 : vector<4x128xf32>
    %211 = math.exp %210 : vector<4x128xf32>
    %cst_58 = arith.constant 1.000000e+00 : f32
    %212 = vector.broadcast %cst_58 : f32 to vector<4x128xf32>
    %213 = arith.addf %212, %211 : vector<4x128xf32>
    %214 = arith.divf %212, %213 : vector<4x128xf32>
    %215 = vector.extract_strided_slice %206 {offsets = [0, 128], sizes = [4, 128], strides = [1, 1]} : vector<4x384xf32> to vector<4x128xf32>
    %216 = vector.extract_strided_slice %205 {offsets = [0, 128], sizes = [4, 128], strides = [1, 1]} : vector<4x384xf32> to vector<4x128xf32>
    %217 = arith.addf %215, %216 : vector<4x128xf32>
    %218 = arith.negf %217 : vector<4x128xf32>
    %219 = math.exp %218 : vector<4x128xf32>
    %cst_59 = arith.constant 1.000000e+00 : f32
    %220 = vector.broadcast %cst_59 : f32 to vector<4x128xf32>
    %221 = arith.addf %220, %219 : vector<4x128xf32>
    %222 = arith.divf %220, %221 : vector<4x128xf32>
    %223 = vector.extract_strided_slice %206 {offsets = [0, 256], sizes = [4, 128], strides = [1, 1]} : vector<4x384xf32> to vector<4x128xf32>
    %224 = vector.extract_strided_slice %205 {offsets = [0, 256], sizes = [4, 128], strides = [1, 1]} : vector<4x384xf32> to vector<4x128xf32>
    %225 = arith.addf %224, %14 : vector<4x128xf32>
    %226 = arith.mulf %214, %225 : vector<4x128xf32>
    %227 = arith.addf %223, %226 : vector<4x128xf32>
    %228 = math.tanh %227 : vector<4x128xf32>
    %cst_60 = arith.constant 1.000000e+00 : f32
    %229 = vector.broadcast %cst_60 : f32 to vector<4x128xf32>
    %230 = arith.subf %229, %222 : vector<4x128xf32>
    %231 = arith.mulf %230, %228 : vector<4x128xf32>
    %232 = arith.mulf %222, %158 : vector<4x128xf32>
    %233 = arith.addf %231, %232 : vector<4x128xf32>
    %234 = arith.index_cast %c2_i32 : i32 to index
    %c0_61 = arith.constant 0 : index
    %c0_62 = arith.constant 0 : index
    %235 = vector.load %arg6[%234, %c0_61, %c0_62] : memref<4x4x128xf32, #tpu.memory_space<vmem>>, vector<1x4x128xf32>
    %236 = vector.shape_cast %235 : vector<1x4x128xf32> to vector<4x128xf32>
    %237 = vector.shape_cast %199 : vector<4x128xf32> to vector<1x4x128xf32>
    tpu.vector_store %arg6[%234, %c0_61, %c0_62], %237 {strides = array<i32>} : memref<4x4x128xf32, #tpu.memory_space<vmem>>, vector<1x4x128xf32>,
    %238 = arith.index_cast %c2_i32 : i32 to index
    %c0_63 = arith.constant 0 : index
    %c0_64 = arith.constant 0 : index
    %239 = vector.load %arg7[%238, %c0_63, %c0_64] : memref<4x4x128xf32, #tpu.memory_space<vmem>>, vector<1x4x128xf32>
    %240 = vector.shape_cast %239 : vector<1x4x128xf32> to vector<4x128xf32>
    %241 = vector.shape_cast %233 : vector<4x128xf32> to vector<1x4x128xf32>
    tpu.vector_store %arg7[%238, %c0_63, %c0_64], %241 {strides = array<i32>} : memref<4x4x128xf32, #tpu.memory_space<vmem>>, vector<1x4x128xf32>,
    %c3_i32_65 = arith.constant 3 : i32
    %242 = arith.index_cast %c3_i32_65 : i32 to index
    %c0_66 = arith.constant 0 : index
    %c0_67 = arith.constant 0 : index
    %243 = vector.load %arg1[%242, %c0_66, %c0_67] : memref<4x4x384xbf16, #tpu.memory_space<vmem>>, vector<1x4x384xbf16>
    %244 = vector.shape_cast %243 : vector<1x4x384xbf16> to vector<4x384xbf16>
    %245 = arith.truncf %199 : vector<4x128xf32> to vector<4x128xbf16>
    %cst_68 = arith.constant dense<0.000000e+00> : vector<4x384xf32>
    %246 = tpu.matmul %245, %4, %cst_68 {dimension_numbers = #tpu.dot_dimension_numbers<[1], [0], [0], [1], [0, 0, 1, 1], [], []>} : vector<4x128xbf16>, vector<128x384xbf16>, vector<4x384xf32> -> vector<4x384xf32>
    %247 = arith.extf %244 : vector<4x384xbf16> to vector<4x384xf32>
    %248 = vector.extract_strided_slice %247 {offsets = [0, 0], sizes = [4, 128], strides = [1, 1]} : vector<4x384xf32> to vector<4x128xf32>
    %249 = vector.extract_strided_slice %246 {offsets = [0, 0], sizes = [4, 128], strides = [1, 1]} : vector<4x384xf32> to vector<4x128xf32>
    %250 = arith.addf %248, %249 : vector<4x128xf32>
    %251 = arith.negf %250 : vector<4x128xf32>
    %252 = math.exp %251 : vector<4x128xf32>
    %cst_69 = arith.constant 1.000000e+00 : f32
    %253 = vector.broadcast %cst_69 : f32 to vector<4x128xf32>
    %254 = arith.addf %253, %252 : vector<4x128xf32>
    %255 = arith.divf %253, %254 : vector<4x128xf32>
    %256 = vector.extract_strided_slice %247 {offsets = [0, 128], sizes = [4, 128], strides = [1, 1]} : vector<4x384xf32> to vector<4x128xf32>
    %257 = vector.extract_strided_slice %246 {offsets = [0, 128], sizes = [4, 128], strides = [1, 1]} : vector<4x384xf32> to vector<4x128xf32>
    %258 = arith.addf %256, %257 : vector<4x128xf32>
    %259 = arith.negf %258 : vector<4x128xf32>
    %260 = math.exp %259 : vector<4x128xf32>
    %cst_70 = arith.constant 1.000000e+00 : f32
    %261 = vector.broadcast %cst_70 : f32 to vector<4x128xf32>
    %262 = arith.addf %261, %260 : vector<4x128xf32>
    %263 = arith.divf %261, %262 : vector<4x128xf32>
    %264 = vector.extract_strided_slice %247 {offsets = [0, 256], sizes = [4, 128], strides = [1, 1]} : vector<4x384xf32> to vector<4x128xf32>
    %265 = vector.extract_strided_slice %246 {offsets = [0, 256], sizes = [4, 128], strides = [1, 1]} : vector<4x384xf32> to vector<4x128xf32>
    %266 = arith.addf %265, %10 : vector<4x128xf32>
    %267 = arith.mulf %255, %266 : vector<4x128xf32>
    %268 = arith.addf %264, %267 : vector<4x128xf32>
    %269 = math.tanh %268 : vector<4x128xf32>
    %cst_71 = arith.constant 1.000000e+00 : f32
    %270 = vector.broadcast %cst_71 : f32 to vector<4x128xf32>
    %271 = arith.subf %270, %263 : vector<4x128xf32>
    %272 = arith.mulf %271, %269 : vector<4x128xf32>
    %273 = arith.mulf %263, %199 : vector<4x128xf32>
    %274 = arith.addf %272, %273 : vector<4x128xf32>
    %c3_i32_72 = arith.constant 3 : i32
    %275 = arith.subi %c3_i32_72, %c3_i32_65 : i32
    %276 = arith.index_cast %275 : i32 to index
    %c0_73 = arith.constant 0 : index
    %c0_74 = arith.constant 0 : index
    %277 = vector.load %arg2[%276, %c0_73, %c0_74] : memref<4x4x384xbf16, #tpu.memory_space<vmem>>, vector<1x4x384xbf16>
    %278 = vector.shape_cast %277 : vector<1x4x384xbf16> to vector<4x384xbf16>
    %279 = arith.truncf %233 : vector<4x128xf32> to vector<4x128xbf16>
    %cst_75 = arith.constant dense<0.000000e+00> : vector<4x384xf32>
    %280 = tpu.matmul %279, %6, %cst_75 {dimension_numbers = #tpu.dot_dimension_numbers<[1], [0], [0], [1], [0, 0, 1, 1], [], []>} : vector<4x128xbf16>, vector<128x384xbf16>, vector<4x384xf32> -> vector<4x384xf32>
    %281 = arith.extf %278 : vector<4x384xbf16> to vector<4x384xf32>
    %282 = vector.extract_strided_slice %281 {offsets = [0, 0], sizes = [4, 128], strides = [1, 1]} : vector<4x384xf32> to vector<4x128xf32>
    %283 = vector.extract_strided_slice %280 {offsets = [0, 0], sizes = [4, 128], strides = [1, 1]} : vector<4x384xf32> to vector<4x128xf32>
    %284 = arith.addf %282, %283 : vector<4x128xf32>
    %285 = arith.negf %284 : vector<4x128xf32>
    %286 = math.exp %285 : vector<4x128xf32>
    %cst_76 = arith.constant 1.000000e+00 : f32
    %287 = vector.broadcast %cst_76 : f32 to vector<4x128xf32>
    %288 = arith.addf %287, %286 : vector<4x128xf32>
    %289 = arith.divf %287, %288 : vector<4x128xf32>
    %290 = vector.extract_strided_slice %281 {offsets = [0, 128], sizes = [4, 128], strides = [1, 1]} : vector<4x384xf32> to vector<4x128xf32>
    %291 = vector.extract_strided_slice %280 {offsets = [0, 128], sizes = [4, 128], strides = [1, 1]} : vector<4x384xf32> to vector<4x128xf32>
    %292 = arith.addf %290, %291 : vector<4x128xf32>
    %293 = arith.negf %292 : vector<4x128xf32>
    %294 = math.exp %293 : vector<4x128xf32>
    %cst_77 = arith.constant 1.000000e+00 : f32
    %295 = vector.broadcast %cst_77 : f32 to vector<4x128xf32>
    %296 = arith.addf %295, %294 : vector<4x128xf32>
    %297 = arith.divf %295, %296 : vector<4x128xf32>
    %298 = vector.extract_strided_slice %281 {offsets = [0, 256], sizes = [4, 128], strides = [1, 1]} : vector<4x384xf32> to vector<4x128xf32>
    %299 = vector.extract_strided_slice %280 {offsets = [0, 256], sizes = [4, 128], strides = [1, 1]} : vector<4x384xf32> to vector<4x128xf32>
    %300 = arith.addf %299, %14 : vector<4x128xf32>
    %301 = arith.mulf %289, %300 : vector<4x128xf32>
    %302 = arith.addf %298, %301 : vector<4x128xf32>
    %303 = math.tanh %302 : vector<4x128xf32>
    %cst_78 = arith.constant 1.000000e+00 : f32
    %304 = vector.broadcast %cst_78 : f32 to vector<4x128xf32>
    %305 = arith.subf %304, %297 : vector<4x128xf32>
    %306 = arith.mulf %305, %303 : vector<4x128xf32>
    %307 = arith.mulf %297, %233 : vector<4x128xf32>
    %308 = arith.addf %306, %307 : vector<4x128xf32>
    %309 = arith.index_cast %c3_i32_65 : i32 to index
    %c0_79 = arith.constant 0 : index
    %c0_80 = arith.constant 0 : index
    %310 = vector.load %arg6[%309, %c0_79, %c0_80] : memref<4x4x128xf32, #tpu.memory_space<vmem>>, vector<1x4x128xf32>
    %311 = vector.shape_cast %310 : vector<1x4x128xf32> to vector<4x128xf32>
    %312 = vector.shape_cast %274 : vector<4x128xf32> to vector<1x4x128xf32>
    tpu.vector_store %arg6[%309, %c0_79, %c0_80], %312 {strides = array<i32>} : memref<4x4x128xf32, #tpu.memory_space<vmem>>, vector<1x4x128xf32>,
    %313 = arith.index_cast %c3_i32_65 : i32 to index
    %c0_81 = arith.constant 0 : index
    %c0_82 = arith.constant 0 : index
    %314 = vector.load %arg7[%313, %c0_81, %c0_82] : memref<4x4x128xf32, #tpu.memory_space<vmem>>, vector<1x4x128xf32>
    %315 = vector.shape_cast %314 : vector<1x4x128xf32> to vector<4x128xf32>
    %316 = vector.shape_cast %308 : vector<4x128xf32> to vector<1x4x128xf32>
    tpu.vector_store %arg7[%313, %c0_81, %c0_82], %316 {strides = array<i32>} : memref<4x4x128xf32, #tpu.memory_space<vmem>>, vector<1x4x128xf32>,
    %c4_i32 = arith.constant 4 : i32
    %c0_83 = arith.constant 0 : index
    %c0_84 = arith.constant 0 : index
    %317 = vector.load %arg9[%c0_83, %c0_84] : memref<4x128xf32, #tpu.memory_space<vmem>>, vector<4x128xf32>
    tpu.vector_store %arg9[%c0_83, %c0_84], %274 {strides = array<i32>} : memref<4x128xf32, #tpu.memory_space<vmem>>, vector<4x128xf32>,
    %c0_85 = arith.constant 0 : index
    %c0_86 = arith.constant 0 : index
    %318 = vector.load %arg10[%c0_85, %c0_86] : memref<4x128xf32, #tpu.memory_space<vmem>>, vector<4x128xf32>
    tpu.vector_store %arg10[%c0_85, %c0_86], %308 {strides = array<i32>} : memref<4x128xf32, #tpu.memory_space<vmem>>, vector<4x128xf32>,
    %c1_i32_87 = arith.constant 1 : i32
    %319 = arith.cmpi eq, %arg0, %c1_i32_87 : i32
    %320 = arith.extui %319 : i1 to i32
    %c0_i32_88 = arith.constant 0 : i32
    %321 = arith.cmpi ne, %320, %c0_i32_88 : i32
    scf.if %321 {
      %c0_89 = arith.constant 0 : index
      %c0_90 = arith.constant 0 : index
      %c0_91 = arith.constant 0 : index
      %322 = vector.load %arg8[%c0_89, %c0_90, %c0_91] : memref<2x4x128xf32, #tpu.memory_space<vmem>>, vector<1x4x128xf32>
      %323 = vector.shape_cast %322 : vector<1x4x128xf32> to vector<4x128xf32>
      %324 = vector.shape_cast %274 : vector<4x128xf32> to vector<1x4x128xf32>
      tpu.vector_store %arg8[%c0_89, %c0_90, %c0_91], %324 {strides = array<i32>} : memref<2x4x128xf32, #tpu.memory_space<vmem>>, vector<1x4x128xf32>,
      %c1_92 = arith.constant 1 : index
      %c0_93 = arith.constant 0 : index
      %c0_94 = arith.constant 0 : index
      %325 = vector.load %arg8[%c1_92, %c0_93, %c0_94] : memref<2x4x128xf32, #tpu.memory_space<vmem>>, vector<1x4x128xf32>
      %326 = vector.shape_cast %325 : vector<1x4x128xf32> to vector<4x128xf32>
      %327 = vector.shape_cast %308 : vector<4x128xf32> to vector<1x4x128xf32>
      tpu.vector_store %arg8[%c1_92, %c0_93, %c0_94], %327 {strides = array<i32>} : memref<2x4x128xf32, #tpu.memory_space<vmem>>, vector<1x4x128xf32>,
    } else {
    }
    return
  }
  func.func @transform_0(%arg0: i32) -> (i32, i32, i32) {
    %c0_i32 = arith.constant 0 : i32
    %c0_i32_0 = arith.constant 0 : i32
    %c0_i32_1 = arith.constant 0 : i32
    return %arg0, %c0_i32, %c0_i32_0 : i32, i32, i32
  }
  func.func @transform_1(%arg0: i32) -> (i32, i32, i32) {
    %c1_i32 = arith.constant 1 : i32
    %0 = arith.subi %c1_i32, %arg0 : i32
    %c0_i32 = arith.constant 0 : i32
    %c0_i32_0 = arith.constant 0 : i32
    %c0_i32_1 = arith.constant 0 : i32
    return %0, %c0_i32, %c0_i32_0 : i32, i32, i32
  }
  func.func @transform_2(%arg0: i32) -> (i32, i32, i32) {
    %c0_i32 = arith.constant 0 : i32
    %c0_i32_0 = arith.constant 0 : i32
    %c0_i32_1 = arith.constant 0 : i32
    %c0_i32_2 = arith.constant 0 : i32
    return %c0_i32, %c0_i32_0, %c0_i32_1 : i32, i32, i32
  }
  func.func @transform_3(%arg0: i32) -> (i32, i32, i32) {
    %c0_i32 = arith.constant 0 : i32
    %c0_i32_0 = arith.constant 0 : i32
    %c0_i32_1 = arith.constant 0 : i32
    %c0_i32_2 = arith.constant 0 : i32
    return %c0_i32, %c0_i32_0, %c0_i32_1 : i32, i32, i32
  }
  func.func @transform_4(%arg0: i32) -> (i32, i32, i32) {
    %c0_i32 = arith.constant 0 : i32
    %c0_i32_0 = arith.constant 0 : i32
    %c0_i32_1 = arith.constant 0 : i32
    %c0_i32_2 = arith.constant 0 : i32
    return %c0_i32, %c0_i32_0, %c0_i32_1 : i32, i32, i32
  }
  func.func @transform_5(%arg0: i32) -> (i32, i32, i32) {
    %c0_i32 = arith.constant 0 : i32
    %c0_i32_0 = arith.constant 0 : i32
    %c0_i32_1 = arith.constant 0 : i32
    return %arg0, %c0_i32, %c0_i32_0 : i32, i32, i32
  }
  func.func @transform_6(%arg0: i32) -> (i32, i32, i32) {
    %c0_i32 = arith.constant 0 : i32
    %c0_i32_0 = arith.constant 0 : i32
    %c0_i32_1 = arith.constant 0 : i32
    return %arg0, %c0_i32, %c0_i32_0 : i32, i32, i32
  }
  func.func @transform_7(%arg0: i32) -> (i32, i32, i32) {
    %c0_i32 = arith.constant 0 : i32
    %c0_i32_0 = arith.constant 0 : i32
    %c0_i32_1 = arith.constant 0 : i32
    %c0_i32_2 = arith.constant 0 : i32
    return %c0_i32, %c0_i32_0, %c0_i32_1 : i32, i32, i32
  }
}

</mosaic_0001>

<bundles_post_ra>
// kernel: reverse
= control target key start
LH: loop header
LB: loop body
LE: loop exit
PB: predicated region body
PF: predicated region fallthrough
CT: control target
= control target key end

     0   :  { %s104_s0 = inlined_call_operand.vmem [shape: f32[8,4,32], index: 0, kind: input, shape index: {}]   ;;  %s105_s1 = inlined_call_operand.vmem [shape: f32[8,4,32], index: 1, kind: output, shape index: {}]  }
   0x1   :  { %v32_v0 = vld [vmem:[%s104_s0 + $0x1c] sm:$0xf]  ;;  %v33_v1 = vld [vmem:[%s104_s0 + $0x18] sm:$0xf]  ;;  %v35_v2 = vld [vmem:[%s104_s0 + $0x14] sm:$0xf] }
   0x2   :  { %4 = vst [vmem:[%s105_s1] sm:$0xf] %v32_v0  ;;  %34 = vst [vmem:[%s105_s1 + $0x4] sm:$0xf] %v33_v1  ;;  %v37_v3 = vld [vmem:[%s104_s0 + $0x10] sm:$0xf] }
   0x3   :  { %36 = vst [vmem:[%s105_s1 + $0x8] sm:$0xf] %v35_v2  ;;  %v39_v4 = vld [vmem:[%s104_s0 + $0xc] sm:$0xf]  ;;  %v41_v5 = vld [vmem:[%s104_s0 + $0x8] sm:$0xf] }
   0x4   :  { %38 = vst [vmem:[%s105_s1 + $0xc] sm:$0xf] %v37_v3  ;;  %40 = vst [vmem:[%s105_s1 + $0x10] sm:$0xf] %v39_v4  ;;  %v43_v6 = vld [vmem:[%s104_s0 + $0x4] sm:$0xf] }
   0x5   :  { %42 = vst [vmem:[%s105_s1 + $0x14] sm:$0xf] %v41_v5  ;;  %v29_v7 = vld [vmem:[%s104_s0] sm:$0xf]  ;;  %44 = vst [vmem:[%s105_s1 + $0x18] sm:$0xf] %v43_v6 }
   0x6   :  { %45 = vst [vmem:[%s105_s1 + $0x1c] sm:$0xf] %v29_v7 }

// kernel: _lambda_.1
= control target key start
LH: loop header
LB: loop body
LE: loop exit
PB: predicated region body
PF: predicated region fallthrough
CT: control target
= control target key end

     0   :  { %13 = vsyncpa [#allocation5], 0  ;;  %s2325_s24 = smov 0   ;;  %s2980_s0 = inlined_call_operand.vmem [shape: bf16[8,4,384], index: 0, kind: input, shape index: {}]   ;;  %s2981_s1 = inlined_call_operand.vmem [shape: bf16[8,4,384], index: 1, kind: input, shape index: {}]   ;;  %s2982_s2 = inlined_call_operand.vmem [shape: f32[2,4,128], index: 2, kind: input, shape index: {}]   ;;  %s2983_s3 = inlined_call_operand.vmem [shape: bf16[2,128,384], index: 3, kind: input, shape index: {}]   ;;  %s2984_s4 = inlined_call_operand.vmem [shape: f32[2,1,128], index: 4, kind: input, shape index: {}]   ;;  %s2985_s5 = inlined_call_operand.vmem [shape: f32[8,4,128], index: 5, kind: output, shape index: {0}]   ;;  %s2986_s6 = inlined_call_operand.vmem [shape: f32[8,4,128], index: 6, kind: output, shape index: {1}]   ;;  %s2987_s7 = inlined_call_operand.hbm [shape: f32[2,4,128], index: 7, kind: output, shape index: {2}]  }
   0x1 LB: > { %s2331_s25 = sadd.s32 4294967295, %s2277_s24   ;;  %p1718_p0 = scmp.ge.s32.totalorder %s2277_s24, 1  ;;  %s2277_s24 = sphi %s2325_s24, %s19_s24  }
   0x2   : > { %p256_p1 = scmp.lt.s32.totalorder %s2277_s24, 3 }
   0x4   : > { %p257_p2 = pnand %p1718_p0, %p256_p1 }
   0x6   : > { %260 = sbr.rel (%p257_p2) target bundleno = 1112 (0x458), region = 40 }
   0xb   : > { %s1719_s26 = sshll.u32 %s2331_s25, 2  ;;  %s308_s27 = ssub.s32 1, %s2331_s25 }
   0xc   : > { %p302_p3 = scmp.lt.s32.totalorder %s1719_s26, 7  ;;  %s1721_s28 = sshll.u32 %s308_s27, 2 }
   0xd   : > { %p310_p4 = scmp.lt.s32.totalorder %s1721_s28, 7  ;;  %p1727_p5 = scmp.ne.s32.totalorder %s2331_s25, 0 }
   0xe   : > { %s3057_s26 = smov (!%p302_p3, %s1719_s26), 7 }
   0xf   : > { %s3059_s28 = smov (!%p310_p4, %s1721_s28), 7  ;;  %s2077_s29 = smul.u32 6, %s3057_s26 }
  0x10   : > { %s1724_s30 = sshll.u32 %s3057_s26, 2  ;;  %s2078_s8 = smul.u32 6, %s3059_s28 }
  0x11   : > { %s2340_s11 = scalar_lea.vmem %s2985_s5, %s1724_s30  ;;  %s2345_s14 = scalar_lea.vmem %s2980_s0, %s2077_s29 }
  0x12   : > { %s2350_s17 = scalar_lea.vmem %s2986_s6, %s1724_s30  ;;  %s2355_s20 = scalar_lea.vmem %s2981_s1, %s2078_s8 }
  0x13   : > { %333 = sbr.rel (%p1727_p5) target bundleno = 26 (0x1a), region = 44 }
  0x18   : > { %v334_v0 = vld [vmem:[%s2982_s2] sm:$0xf]  ;;  %v1728_v1 = vld [vmem:[%s2982_s2 + $0x4] sm:$0xf] }
  0x19   : > { %335 = vst [vmem:[#allocation2] sm:$0xf] %v334_v0  ;;  %338 = vst [vmem:[#allocation3] sm:$0xf] %v1728_v1 }
  0x1a PF: > { %v2367_v2 = vld [vmem:[%s2983_s3 + $0xac] ss:$12 sps:$4 sm:$0xff]   ;;  %v2372_v3 = vld [vmem:[%s2983_s3 + $0xa8] ss:$12 sps:$4 sm:$0xff]   ;;  %v2996_v4 = vmov 0.0   ;;  %v2988_v5 = vmov 0  }
  0x1b   : > { %1917 = vmatprep.subr.bf16.mxu1 %v2996_v4  ;;  %583 = vmatprep.mubr.bf16.mxu0 %v2988_v5  ;;  %v2380_v6 = vld [vmem:[%s2983_s3 + $0x94] ss:$12 sps:$4 sm:$0xff]   ;;  %vm2281_vm0 = vmmov 0   ;;  %v2388_v7 = vld [vmem:[%s2983_s3 + $0x90] ss:$12 sps:$4 sm:$0xff]   ;;  %p1840_p6 = scmp.ne.s32.totalorder %s2331_s25, 1 }
  0x1c   : > { %551 = vmatprep.subr.bf16.mxu0 %v2367_v2  ;;  %1933 = vmatprep.mubr.msk.bf16.mxu1 %vm2281_vm0, %v2996_v4  ;;  %v2394_v8 = vld [vmem:[%s2983_s3 + $0x7c] ss:$12 sps:$4 sm:$0xff]   ;;  %v2400_v9 = vld [vmem:[%s2983_s3 + $0x78] ss:$12 sps:$4 sm:$0xff]   ;;  %v2417_v12 = vld [vmem:[%s2983_s3 + $0x60] ss:$12 sps:$4 sm:$0xff]  }
  0x1d   : > { %552 = vmatpush1.bf16.msra.mxu0 %v2372_v3  ;;  %v2406_v10 = vld [vmem:[%s2983_s3 + $0x64] ss:$12 sps:$4 sm:$0xff]   ;;  %v2423_v13 = vld [vmem:[%s2983_s3 + $0x4c] ss:$12 sps:$4 sm:$0xff]   ;;  %v2436_v15 = vld [vmem:[%s2983_s3 + $0x48] ss:$12 sps:$4 sm:$0xff]  }
  0x1e   : > { %553 = vmatprep.subr.bf16.mxu0 %v2380_v6  ;;  %v2411_v11 = vld [vmem:[%s2983_s3 + $0xb0] ss:$12 sps:$4 sm:$0xff]   ;;  %3016 = vst [vmem:[#allocation7_spill] sm:$0xff] %v2423_v13  ;;  %v2429_v14 = vld [vmem:[%s2983_s3 + $0x98] ss:$12 sps:$4 sm:$0xff]   ;;  %3017 = vst [vmem:[#allocation8_spill] sm:$0xff] %v2436_v15 }
  0x1f   : > { %1918 = vmatpush3.bf16.msra.mxu1 %v2411_v11  ;;  %v2442_v16 = vld [vmem:[%s2983_s3 + $0x34] ss:$12 sps:$4 sm:$0xff]   ;;  %v2454_v18 = vld [vmem:[%s2983_s3 + $0x30] ss:$12 sps:$4 sm:$0xff]   ;;  %v2474_v21 = vld [vmem:[%s2983_s3 + $0x18] ss:$12 sps:$4 sm:$0xff]  }
  0x20   : > { %1919 = vmatprep.subr.bf16.mxu1 %v2996_v4  ;;  %3018 = vst [vmem:[#allocation9_spill] sm:$0xff] %v2442_v16  ;;  %v2448_v17 = vld [vmem:[%s2983_s3 + $0x80] ss:$12 sps:$4 sm:$0xff]   ;;  %3019 = vst [vmem:[#allocation10_spill] sm:$0xff] %v2454_v18  ;;  %v2460_v19 = vld [vmem:[%s2983_s3 + $0x1c] ss:$12 sps:$4 sm:$0xff]  }
  0x21   : > { %554 = vmatpush1.bf16.msra.mxu0 %v2388_v7  ;;  %3020 = vst [vmem:[#allocation11_spill] sm:$0xff] %v2460_v19  ;;  %v2467_v20 = vld [vmem:[%s2983_s3 + $0x68] ss:$12 sps:$4 sm:$0xff]   ;;  %3021 = vst [vmem:[#allocation12_spill] sm:$0xff] %v2474_v21  ;;  %v2479_v22 = vld [vmem:[%s2983_s3 + $0x4] ss:$12 sps:$4 sm:$0xff]  }
  0x22   : > { %555 = vmatprep.subr.bf16.mxu0 %v2394_v8  ;;  %3022 = vst [vmem:[#allocation13_spill] sm:$0xff] %v2479_v22  ;;  %v2486_v23 = vld [vmem:[%s2983_s3 + $0x50] ss:$12 sps:$4 sm:$0xff]   ;;  %v2491_v24 = vld [vmem:[%s2983_s3] ss:$12 sps:$4 sm:$0xff]  }
  0x23   : > { %1920 = vmatpush3.bf16.msra.mxu1 %v2429_v14  ;;  %3023 = vst [vmem:[#allocation14_spill] sm:$0xff] %v2486_v23  ;;  %3024 = vst [vmem:[#allocation15_spill] sm:$0xff] %v2491_v24  ;;  %v2494_v25 = vld [vmem:[#allocation2] sm:$0xf]  ;;  %v2500_v26 = vld [vmem:[%s2983_s3 + $0x16c] ss:$12 sps:$4 sm:$0xff]  }
  0x24   : > { %1921 = vmatprep.subr.bf16.mxu1 %v2996_v4  ;;  %3025 = vst [vmem:[#allocation16_spill] sm:$0xff] %v2500_v26  ;;  %v2507_v27 = vld [vmem:[%s2983_s3 + $0x38] ss:$12 sps:$4 sm:$0xff]   ;;  %v422_v28 = vpack.c.bf16 %v2494_v25, %v2494_v25  ;;  %v2516_v29 = vld [vmem:[%s2983_s3 + $0x168] ss:$12 sps:$4 sm:$0xff]  }
  0x25   : > { %556 = vmatpush1.bf16.msra.mxu0 %v2400_v9  ;;  %3026 = vst [vmem:[#allocation17_spill] sm:$0xff] %v2507_v27  ;;  %v2521_v30 = vld [vmem:[%s2983_s3 + $0x154] ss:$12 sps:$4 sm:$0xff]   ;;  %v2534_v32 = vld [vmem:[%s2983_s3 + $0x150] ss:$12 sps:$4 sm:$0xff]  }
  0x26   : > { %557 = vmatprep.subr.bf16.mxu0 %v2406_v10  ;;  %v2528_v31 = vld [vmem:[%s2983_s3 + $0x20] ss:$12 sps:$4 sm:$0xff]   ;;  %v2540_v33 = vld [vmem:[%s2983_s3 + $0x13c] ss:$12 sps:$4 sm:$0xff]   ;;  %v2555_v35 = vld [vmem:[%s2983_s3 + $0x138] ss:$12 sps:$4 sm:$0xff]  }
  0x27   : > { %1922 = vmatpush3.bf16.msra.mxu1 %v2448_v17  ;;  %3027 = vst [vmem:[#allocation18_spill] sm:$0xff] %v2528_v31  ;;  %v2548_v34 = vld [vmem:[%s2983_s3 + $0x8] ss:$12 sps:$4 sm:$0xff]   ;;  %v2561_v36 = vld [vmem:[%s2983_s3 + $0x124] ss:$12 sps:$4 sm:$0xff]  }
  0x28   : > { %1923 = vmatprep.subr.bf16.mxu1 %v2996_v4  ;;  %3028 = vst [vmem:[#allocation19_spill] sm:$0xff] %v2548_v34  ;;  %v2567_v37 = vld [vmem:[%s2983_s3 + $0x170] ss:$12 sps:$4 sm:$0xff]   ;;  %v2574_v38 = vld [vmem:[%s2983_s3 + $0x120] ss:$12 sps:$4 sm:$0xff]  }
  0x29   : > { %558 = vmatpush1.bf16.msra.mxu0 %v2417_v12  ;;  %v2580_v39 = vld [vmem:[%s2983_s3 + $0x10c] ss:$12 sps:$4 sm:$0xff]   ;;  %v2595_v41 = vld [vmem:[%s2983_s3 + $0x108] ss:$12 sps:$4 sm:$0xff]   ;;  %v2614_v44 = vld [vmem:[%s2983_s3 + $0xf0] ss:$12 sps:$4 sm:$0xff]  }
  0x2a   : > { %559 = vmatprep.subr.bf16.mxu0 %v2423_v13  ;;  %v2586_v40 = vld [vmem:[%s2983_s3 + $0x158] ss:$12 sps:$4 sm:$0xff]   ;;  %v2601_v42 = vld [vmem:[%s2983_s3 + $0xf4] ss:$12 sps:$4 sm:$0xff]   ;;  %v2620_v45 = vld [vmem:[%s2983_s3 + $0xdc] ss:$12 sps:$4 sm:$0xff]  }
  0x2b   : > { %1924 = vmatpush3.bf16.msra.mxu1 %v2467_v20  ;;  %v2607_v43 = vld [vmem:[%s2983_s3 + $0x140] ss:$12 sps:$4 sm:$0xff]   ;;  %v2626_v46 = vld [vmem:[%s2983_s3 + $0x128] ss:$12 sps:$4 sm:$0xff]   ;;  %v2633_v47 = vld [vmem:[%s2983_s3 + $0xd8] ss:$12 sps:$4 sm:$0xff]  }
  0x2c   : > { %1925 = vmatprep.subr.bf16.mxu1 %v2996_v4  ;;  %v2639_v48 = vld [vmem:[%s2983_s3 + $0xc4] ss:$12 sps:$4 sm:$0xff]   ;;  %v2652_v50 = vld [vmem:[%s2983_s3 + $0xc0] ss:$12 sps:$4 sm:$0xff]   ;;  %v2681_v55 = vld [vmem:[%s2983_s3 + $0xc8] ss:$12 sps:$4 sm:$0xff]  }
  0x2d   : > { %560 = vmatpush1.bf16.msra.mxu0 %v2436_v15  ;;  %v2645_v49 = vld [vmem:[%s2983_s3 + $0x110] ss:$12 sps:$4 sm:$0xff]   ;;  %v2654_v51 = vld [vmem:[#allocation3] sm:$0xf]  ;;  %v2671_v54 = vld [vmem:[%s2983_s3 + $0xe0] ss:$12 sps:$4 sm:$0xff]  }
  0x2e   : > { %561 = vmatprep.subr.bf16.mxu0 %v2442_v16  ;;  %v2661_v52 = vld [vmem:[%s2983_s3 + $0xf8] ss:$12 sps:$4 sm:$0xff]   ;;  %v661_v53 = vpack.c.bf16 %v2654_v51, %v2654_v51 }
  0x2f   : > { %1926 = vmatpush3.bf16.msra.mxu1 %v2486_v23  ;;  %v421_v56 = vld [vmem:[%s2345_s14] sm:$0x3f] }
  0x30   : > { %1927 = vmatprep.subr.bf16.mxu1 %v2996_v4  ;;  %v632_v57 = vunpack.c.l.bf16 %v421_v56 }
  0x31   : > { %562 = vmatpush1.bf16.msra.mxu0 %v2454_v18 }
  0x32   : > { %563 = vmatprep.subr.bf16.mxu0 %v2460_v19  ;;  %v642_v62 = vrot.slane %v632_v57, 4 }
  0x33   : > { %1928 = vmatpush3.bf16.msra.mxu1 %v2507_v27 }
  0x34   : > { %1929 = vmatprep.subr.bf16.mxu1 %v2996_v4 }
  0x35   : > { %564 = vmatpush1.bf16.msra.mxu0 %v2474_v21 }
  0x36   : > { %565 = vmatprep.subr.bf16.mxu0 %v2479_v22 }
  0x37   : > { %1930 = vmatpush3.bf16.msra.mxu1 %v2528_v31 }
  0x38   : > { %1931 = vmatprep.subr.bf16.mxu1 %v2996_v4 }
  0x39   : > { %566 = vmatpush1.bf16.msra.mxu0 %v2491_v24 }
  0x3a   : > { %790 = vmatprep.subr.bf16.mxu0 %v2500_v26 }
  0x3b   : > { %1932 = vmatpush3.bf16.msra.mxu1 %v2548_v34 }
  0x3c   : > { %584 = vmatmul.mubr.bf16.vlgmr.msra.gmra.mxu0 %v422_v28  ;;  %1937 = vmatprep.subr.bf16.mxu1 %v2996_v4 }
  0x3d   : > { %791 = vmatpush1.bf16.msra.mxu0 %v2516_v29  ;;  %822 = vmatprep.mubr.bf16.mxu0 %v2988_v5 }
  0x3e   : > { %792 = vmatprep.subr.bf16.mxu0 %v2521_v30  ;;  %1934 = vmatmul.mubr.bf16.vlgmr.msra.gmra.mxu1 %v422_v28 }
  0x3f   : > { %1938 = vmatpush3.bf16.msra.mxu1 %v2567_v37  ;;  %1953 = vmatprep.mubr.msk.bf16.mxu1 %vm2281_vm0, %v2996_v4 }
  0x40   : > { %1939 = vmatprep.subr.bf16.mxu1 %v2996_v4 }
  0x41   : > { %793 = vmatpush1.bf16.msra.mxu0 %v2534_v32 }
  0x42   : > { %794 = vmatprep.subr.bf16.mxu0 %v2540_v33 }
  0x43   : > { %1940 = vmatpush3.bf16.msra.mxu1 %v2586_v40 }
  0x44   : > { %1941 = vmatprep.subr.bf16.mxu1 %v2996_v4 }
  0x45   : > { %795 = vmatpush1.bf16.msra.mxu0 %v2555_v35 }
  0x46   : > { %796 = vmatprep.subr.bf16.mxu0 %v2561_v36 }
  0x47   : > { %1942 = vmatpush3.bf16.msra.mxu1 %v2607_v43 }
  0x48   : > { %1943 = vmatprep.subr.bf16.mxu1 %v2996_v4 }
  0x49   : > { %797 = vmatpush1.bf16.msra.mxu0 %v2574_v38 }
  0x4a   : > { %798 = vmatprep.subr.bf16.mxu0 %v2580_v39 }
  0x4b   : > { %1944 = vmatpush3.bf16.msra.mxu1 %v2626_v46 }
  0x4c   : > { %1945 = vmatprep.subr.bf16.mxu1 %v2996_v4 }
  0x4d   : > { %799 = vmatpush1.bf16.msra.mxu0 %v2595_v41 }
  0x4e   : > { %800 = vmatprep.subr.bf16.mxu0 %v2601_v42 }
  0x4f   : > { %1946 = vmatpush3.bf16.msra.mxu1 %v2645_v49 }
  0x50   : > { %1947 = vmatprep.subr.bf16.mxu1 %v2996_v4 }
  0x51   : > { %801 = vmatpush1.bf16.msra.mxu0 %v2614_v44 }
  0x52   : > { %802 = vmatprep.subr.bf16.mxu0 %v2620_v45 }
  0x53   : > { %1948 = vmatpush3.bf16.msra.mxu1 %v2661_v52 }
  0x54   : > { %1949 = vmatprep.subr.bf16.mxu1 %v2996_v4 }
  0x55   : > { %803 = vmatpush1.bf16.msra.mxu0 %v2633_v47 }
  0x56   : > { %804 = vmatprep.subr.bf16.mxu0 %v2639_v48 }
  0x57   : > { %1950 = vmatpush3.bf16.msra.mxu1 %v2671_v54 }
  0x58   : > { %1951 = vmatprep.subr.bf16.mxu1 %v2996_v4 }
  0x59   : > { %805 = vmatpush1.bf16.msra.mxu0 %v2652_v50 }
  0x5a   : > { %903 = vmatprep.subr.bf16.mxu0 %v2367_v2 }
  0x5b   : > { %1952 = vmatpush3.bf16.msra.mxu1 %v2681_v55 }
  0x5c   : > { %823 = vmatmul.mubr.bf16.vlgmr.msra.gmra.mxu0 %v661_v53  ;;  %1957 = vmatprep.subr.bf16.mxu1 %v2996_v4 }
  0x5d   : > { %904 = vmatpush1.bf16.msra.mxu0 %v2372_v3  ;;  %935 = vmatprep.mubr.bf16.mxu0 %v2988_v5 }
  0x5e   : > { %905 = vmatprep.subr.bf16.mxu0 %v2380_v6  ;;  %1954 = vmatmul.mubr.bf16.vlgmr.msra.gmra.mxu1 %v661_v53 }
  0x5f   : > { %1958 = vmatpush3.bf16.msra.mxu1 %v2411_v11  ;;  %1973 = vmatprep.mubr.msk.bf16.mxu1 %vm2281_vm0, %v2996_v4 }
  0x60   : > { %1959 = vmatprep.subr.bf16.mxu1 %v2996_v4 }
  0x61   : > { %906 = vmatpush1.bf16.msra.mxu0 %v2388_v7 }
  0x62   : > { %907 = vmatprep.subr.bf16.mxu0 %v2394_v8 }
  0x63   : > { %1960 = vmatpush3.bf16.msra.mxu1 %v2429_v14 }
  0x64   : > { %1961 = vmatprep.subr.bf16.mxu1 %v2996_v4 }
  0x65   : > { %908 = vmatpush1.bf16.msra.mxu0 %v2400_v9 }
  0x66   : > { %909 = vmatprep.subr.bf16.mxu0 %v2406_v10 }
  0x67   : > { %1962 = vmatpush3.bf16.msra.mxu1 %v2448_v17 }
  0x68   : > { %1963 = vmatprep.subr.bf16.mxu1 %v2996_v4 }
  0x69   : > { %910 = vmatpush1.bf16.msra.mxu0 %v2417_v12 }
  0x6a   : > { %911 = vmatprep.subr.bf16.mxu0 %v2423_v13 }
  0x6b   : > { %1964 = vmatpush3.bf16.msra.mxu1 %v2467_v20 }
  0x6c   : > { %1965 = vmatprep.subr.bf16.mxu1 %v2996_v4 }
  0x6d   : > { %912 = vmatpush1.bf16.msra.mxu0 %v2436_v15 }
  0x6e   : > { %913 = vmatprep.subr.bf16.mxu0 %v2442_v16 }
  0x6f   : > { %1966 = vmatpush3.bf16.msra.mxu1 %v2486_v23 }
  0x70   : > { %1967 = vmatprep.subr.bf16.mxu1 %v2996_v4 }
  0x71   : > { %914 = vmatpush1.bf16.msra.mxu0 %v2454_v18 }
  0x72   : > { %915 = vmatprep.subr.bf16.mxu0 %v2460_v19 }
  0x73   : > { %1968 = vmatpush3.bf16.msra.mxu1 %v2507_v27 }
  0x74   : > { %1969 = vmatprep.subr.bf16.mxu1 %v2996_v4 }
  0x75   : > { %916 = vmatpush1.bf16.msra.mxu0 %v2474_v21 }
  0x76   : > { %917 = vmatprep.subr.bf16.mxu0 %v2479_v22  ;;  %v1790_v22 = vld [vmem:[%s2355_s20 + $0x12] sm:$0x3f] }
  0x77   : > { %1970 = vmatpush3.bf16.msra.mxu1 %v2528_v31 }
  0x78   : > { %1971 = vmatprep.subr.bf16.mxu1 %v2996_v4 }
  0x79   : > { %918 = vmatpush1.bf16.msra.mxu0 %v2491_v24 }
  0x7a   : > { %1014 = vmatprep.subr.bf16.mxu0 %v2500_v26 }
  0x7b   : > { %1972 = vmatpush3.bf16.msra.mxu1 %v2548_v34 }
  0x7c   : > { %1977 = vmatprep.subr.bf16.mxu1 %v2996_v4 }
  0xfc   : > { %v585_v58 = vpop.f32.mrf.mxu0 }
  0xfd   : > { %v634_v59 = vadd.f32 %v632_v57, %v585_v58  ;;  %v2724_v58 = vld [vmem:[%s2984_s4] ss:$0 sm:$0xff]  ;;  %v871_v57 = vunpack.c.l.bf16 %v1790_v22 }
  0xfe   : > { %v587_v60 = vpop.f32.mrf.mxu0  ;;  %v626_v28 = vpop.f32.mrf.mxu1  ;;  %3029 = vst [vmem:[#allocation20_spill] sm:$0xff] %v2724_v58 }
  0xff   : > { %v1788_v61 = vmul.f32 -1.442695, %v634_v59  ;;  %v644_v1 = vadd.f32 %v642_v62, %v587_v60  ;;  %v651_v60 = vadd.f32 %v2724_v58, %v626_v28  ;;  %v633_v62 = vunpack.c.h.bf16 %v421_v56 }
 0x100   : > { %v589_v63 = vpop.f32.mrf.mxu0  ;;  %v1935_v5 = vpop.f32.mrf.mxu1 }
 0x101   : > { %2163 = vpow2.f32 %v1788_v61  ;;  %v1789_v53 = vmul.f32 -1.442695, %v644_v1 }
 0x102   : > { %v590_v0 = vpop.f32.mrf.mxu0  ;;  %v629_v26 = vpop.f32.mrf.mxu1 }
 0x103   : > { %2165 = vpow2.f32 %v1789_v53 }
 0x104   : > { %v1936_v34 = vpop.f32.mrf.mxu1 }
 0x10e   : > { %v2164_v24 = vpop.eup %2163 }
 0x10f   : > { %v638_v4 = vadd.f32 1.0, %v2164_v24 }
 0x110   : > { %v2166_v31 = vpop.eup %2165 }
 0x111   : > { %2167 = vrcp.f32 %v638_v4  ;;  %v648_v59 = vadd.f32 1.0, %v2166_v31  ;;  %v881_v4 = vrot.slane %v871_v57, 4 }
 0x113   : > { %2169 = vrcp.f32 %v648_v59 }
 0x11c   : > { %v824_v61 = vpop.f32.mrf.mxu0 }
 0x11d   : > { %v873_v5 = vadd.f32 %v871_v57, %v824_v61 }
 0x11e   : > { %v2168_v26 = vpop.eup %2167  ;;  %v826_v63 = vpop.f32.mrf.mxu0 }
 0x11f   : > { %v652_v34 = vmul.f32 %v2168_v26, %v651_v60  ;;  %v1815_v24 = vmul.f32 -1.442695, %v873_v5  ;;  %v883_v21 = vadd.f32 %v881_v4, %v826_v63  ;;  %v865_v19 = vpop.f32.mrf.mxu1 }
 0x120   : > { %v828_v0 = vpop.f32.mrf.mxu0  ;;  %v2170_v61 = vpop.eup %2169 }
 0x121   : > { %v653_v1 = vadd.f32 %v652_v34, %v633_v62  ;;  %2171 = vpow2.f32 %v1815_v24  ;;  %v1816_v31 = vmul.f32 -1.442695, %v883_v21  ;;  %v1955_v27 = vpop.f32.mrf.mxu1  ;;  %v655_v59 = vsub.f32 1.0, %v2170_v61 }
 0x122   : > { %v829_v53 = vpop.f32.mrf.mxu0  ;;  %v657_v62 = vmul.f32 %v2170_v61, %v2494_v25  ;;  %v3031_v25 = vmov 0   ;;  %v872_v34 = vunpack.c.h.bf16 %v1790_v22  ;;  %v3033_v61 = vld [vmem:[#allocation17_spill] sm:$0xff] }
 0x123   : > { %2173 = vtanh.f32 %v653_v1  ;;  %v868_v28 = vpop.f32.mrf.mxu1 }
 0x124   : > { %2175 = vpow2.f32 %v1816_v31 }
 0x125   : > { %v1956_v56 = vpop.f32.mrf.mxu1 }
 0x12e   : > { %v2172_v58 = vpop.eup %2171 }
 0x12f   : > { %v877_v18 = vadd.f32 1.0, %v2172_v58  ;;  %v2737_v58 = vld [vmem:[%s2984_s4 + $0x1] ss:$0 sm:$0xff] }
 0x130   : > { %v2174_v60 = vpop.eup %2173  ;;  %v890_v63 = vadd.f32 %v2737_v58, %v865_v19 }
 0x131   : > { %2177 = vrcp.f32 %v877_v18  ;;  %v656_v57 = vmul.f32 %v2174_v60, %v655_v59  ;;  %v2176_v27 = vpop.eup %2175  ;;  %v3030_v18 = vmov 0.0   ;;  %v3034_v59 = vld [vmem:[#allocation11_spill] sm:$0xff]  ;;  %v3035_v60 = vld [vmem:[#allocation12_spill] sm:$0xff] }
 0x132   : > { %v887_v26 = vadd.f32 1.0, %v2176_v27  ;;  %v3039_v27 = vld [vmem:[#allocation19_spill] sm:$0xff] }
 0x133   : > { %v2728_v5 = vadd.f32 %v657_v62, %v656_v57  ;;  %v3036_v57 = vld [vmem:[#allocation18_spill] sm:$0xff]  ;;  %v3037_v62 = vld [vmem:[#allocation13_spill] sm:$0xff] }
 0x134   : > { %2179 = vrcp.f32 %v887_v26  ;;  %v3040_v26 = vld [vmem:[#allocation16_spill] sm:$0xff] }
 0x135   : > { %898 = vst [vmem:[%s2340_s11] sm:$0xf] %v2728_v5  ;;  %v902_v21 = vpack.c.bf16 %v2728_v5, %v2728_v5 }
 0x137   : > { %936 = vmatmul.mubr.bf16.vlgmr.msra.gmra.mxu0 %v902_v21  ;;  %1974 = vmatmul.mubr.bf16.vlgmr.msra.gmra.mxu1 %v902_v21  ;;  %v3038_v21 = vld [vmem:[#allocation15_spill] sm:$0xff] }
 0x138   : > { %1015 = vmatpush1.bf16.msra.mxu0 %v2516_v29  ;;  %1978 = vmatpush3.bf16.msra.mxu1 %v2567_v37 }
 0x139   : > { %1016 = vmatprep.subr.bf16.mxu0 %v2521_v30  ;;  %1979 = vmatprep.subr.bf16.mxu1 %v3030_v18 }
 0x13a   : > { %1046 = vmatprep.mubr.bf16.mxu0 %v3031_v25  ;;  %1993 = vmatprep.mubr.msk.bf16.mxu1 %vm2281_vm0, %v3030_v18 }
 0x13c   : > { %1017 = vmatpush1.bf16.msra.mxu0 %v2534_v32  ;;  %1980 = vmatpush3.bf16.msra.mxu1 %v2586_v40 }
 0x13d   : > { %1018 = vmatprep.subr.bf16.mxu0 %v2540_v33  ;;  %1981 = vmatprep.subr.bf16.mxu1 %v3030_v18 }
 0x13e   : > { %v2178_v24 = vpop.eup %2177 }
 0x13f   : > { %v891_v4 = vmul.f32 %v2178_v24, %v890_v63  ;;  %v1817_v63 = vld [vmem:[%s2345_s14 + $0x6] sm:$0x3f] }
 0x140   : > { %1019 = vmatpush1.bf16.msra.mxu0 %v2555_v35  ;;  %1982 = vmatpush3.bf16.msra.mxu1 %v2607_v43 }
 0x141   : > { %v892_v0 = vadd.f32 %v891_v4, %v872_v34  ;;  %1020 = vmatprep.subr.bf16.mxu0 %v2561_v36  ;;  %1983 = vmatprep.subr.bf16.mxu1 %v3030_v18  ;;  %v2180_v19 = vpop.eup %2179  ;;  %v984_v34 = vunpack.c.l.bf16 %v1817_v63 }
 0x142   : > { %v894_v22 = vsub.f32 1.0, %v2180_v19  ;;  %v896_v31 = vmul.f32 %v2180_v19, %v2654_v51  ;;  %v3032_v51 = vld [vmem:[#allocation10_spill] sm:$0xff] }
 0x143   : > { %2181 = vtanh.f32 %v892_v0 }
 0x144   : > { %1021 = vmatpush1.bf16.msra.mxu0 %v2574_v38  ;;  %1984 = vmatpush3.bf16.msra.mxu1 %v2626_v46 }
 0x145   : > { %1022 = vmatprep.subr.bf16.mxu0 %v2580_v39  ;;  %1985 = vmatprep.subr.bf16.mxu1 %v3030_v18 }
 0x148   : > { %1023 = vmatpush1.bf16.msra.mxu0 %v2595_v41  ;;  %1986 = vmatpush3.bf16.msra.mxu1 %v2645_v49 }
 0x149   : > { %1024 = vmatprep.subr.bf16.mxu0 %v2601_v42  ;;  %1987 = vmatprep.subr.bf16.mxu1 %v3030_v18 }
 0x14c   : > { %1025 = vmatpush1.bf16.msra.mxu0 %v2614_v44  ;;  %1988 = vmatpush3.bf16.msra.mxu1 %v2661_v52 }
 0x14d   : > { %1026 = vmatprep.subr.bf16.mxu0 %v2620_v45  ;;  %1989 = vmatprep.subr.bf16.mxu1 %v3030_v18 }
 0x150   : > { %v2182_v1 = vpop.eup %2181  ;;  %1027 = vmatpush1.bf16.msra.mxu0 %v2633_v47  ;;  %1990 = vmatpush3.bf16.msra.mxu1 %v2671_v54 }
 0x151   : > { %1028 = vmatprep.subr.bf16.mxu0 %v2639_v48  ;;  %1991 = vmatprep.subr.bf16.mxu1 %v3030_v18  ;;  %v895_v53 = vmul.f32 %v2182_v1, %v894_v22 }
 0x153   : > { %v2772_v28 = vadd.f32 %v896_v31, %v895_v53  ;;  %v994_v53 = vrot.slane %v984_v34, 4 }
 0x154   : > { %1029 = vmatpush1.bf16.msra.mxu0 %v2652_v50  ;;  %1992 = vmatpush3.bf16.msra.mxu1 %v2681_v55 }
 0x155   : > { %899 = vst [vmem:[%s2350_s17] sm:$0xf] %v2772_v28  ;;  %v1013_v56 = vpack.c.bf16 %v2772_v28, %v2772_v28  ;;  %1129 = vmatprep.subr.bf16.mxu0 %v2367_v2  ;;  %1997 = vmatprep.subr.bf16.mxu1 %v3030_v18 }
 0x157   : > { %1047 = vmatmul.mubr.bf16.vlgmr.msra.gmra.mxu0 %v1013_v56  ;;  %1994 = vmatmul.mubr.bf16.vlgmr.msra.gmra.mxu1 %v1013_v56 }
 0x158   : > { %1130 = vmatpush1.bf16.msra.mxu0 %v2372_v3  ;;  %1998 = vmatpush3.bf16.msra.mxu1 %v2411_v11 }
 0x159   : > { %1131 = vmatprep.subr.bf16.mxu0 %v2380_v6  ;;  %1999 = vmatprep.subr.bf16.mxu1 %v3030_v18 }
 0x15a   : > { %1161 = vmatprep.mubr.bf16.mxu0 %v3031_v25  ;;  %2013 = vmatprep.mubr.msk.bf16.mxu1 %vm2281_vm0, %v3030_v18 }
 0x15c   : > { %1132 = vmatpush1.bf16.msra.mxu0 %v2388_v7  ;;  %2000 = vmatpush3.bf16.msra.mxu1 %v2429_v14 }
 0x15d   : > { %1133 = vmatprep.subr.bf16.mxu0 %v2394_v8  ;;  %2001 = vmatprep.subr.bf16.mxu1 %v3030_v18 }
 0x160   : > { %1134 = vmatpush1.bf16.msra.mxu0 %v2400_v9  ;;  %2002 = vmatpush3.bf16.msra.mxu1 %v2448_v17 }
 0x161   : > { %1135 = vmatprep.subr.bf16.mxu0 %v2406_v10  ;;  %2003 = vmatprep.subr.bf16.mxu1 %v3030_v18 }
 0x164   : > { %1136 = vmatpush1.bf16.msra.mxu0 %v2417_v12  ;;  %2004 = vmatpush3.bf16.msra.mxu1 %v2467_v20 }
 0x165   : > { %1137 = vmatprep.subr.bf16.mxu0 %v2423_v13  ;;  %2005 = vmatprep.subr.bf16.mxu1 %v3030_v18 }
 0x168   : > { %1138 = vmatpush1.bf16.msra.mxu0 %v2436_v15  ;;  %2006 = vmatpush3.bf16.msra.mxu1 %v2486_v23 }
 0x169   : > { %1139 = vmatprep.subr.bf16.mxu0 %v2442_v16  ;;  %2007 = vmatprep.subr.bf16.mxu1 %v3030_v18 }
 0x16c   : > { %1140 = vmatpush1.bf16.msra.mxu0 %v3032_v51  ;;  %2008 = vmatpush3.bf16.msra.mxu1 %v3033_v61 }
 0x16d   : > { %1141 = vmatprep.subr.bf16.mxu0 %v3034_v59  ;;  %2009 = vmatprep.subr.bf16.mxu1 %v3030_v18  ;;  %v1820_v59 = vld [vmem:[%s2355_s20 + $0xc] sm:$0x3f] }
 0x16e   : > { %v1095_v51 = vunpack.c.l.bf16 %v1820_v59 }
 0x170   : > { %1142 = vmatpush1.bf16.msra.mxu0 %v3035_v60  ;;  %2010 = vmatpush3.bf16.msra.mxu1 %v3036_v57 }
 0x171   : > { %1143 = vmatprep.subr.bf16.mxu0 %v3037_v62  ;;  %2011 = vmatprep.subr.bf16.mxu1 %v3030_v18 }
 0x174   : > { %1144 = vmatpush1.bf16.msra.mxu0 %v3038_v21  ;;  %2012 = vmatpush3.bf16.msra.mxu1 %v3039_v27 }
 0x175   : > { %1240 = vmatprep.subr.bf16.mxu0 %v3040_v26  ;;  %2017 = vmatprep.subr.bf16.mxu1 %v3030_v18 }
 0x1f7   : > { %v937_v24 = vpop.f32.mrf.mxu0  ;;  %v978_v4 = vpop.f32.mrf.mxu1 }
 0x1f8   : > { %v986_v0 = vadd.f32 %v984_v34, %v937_v24 }
 0x1f9   : > { %v939_v19 = vpop.f32.mrf.mxu0  ;;  %v1975_v22 = vpop.f32.mrf.mxu1 }
 0x1fa   : > { %v1818_v1 = vmul.f32 -1.442695, %v986_v0  ;;  %v996_v27 = vadd.f32 %v994_v53, %v939_v19  ;;  %v985_v22 = vunpack.c.h.bf16 %v1817_v63  ;;  %v3041_v0 = vld [vmem:[#allocation20_spill] sm:$0xff] }
 0x1fb   : > { %v941_v31 = vpop.f32.mrf.mxu0  ;;  %v981_v56 = vpop.f32.mrf.mxu1  ;;  %v1003_v34 = vadd.f32 %v3041_v0, %v978_v4 }
 0x1fc   : > { %2183 = vpow2.f32 %v1818_v1  ;;  %v1819_v57 = vmul.f32 -1.442695, %v996_v27 }
 0x1fd   : > { %v942_v21 = vpop.f32.mrf.mxu0  ;;  %v1976_v62 = vpop.f32.mrf.mxu1 }
 0x1fe   : > { %2185 = vpow2.f32 %v1819_v57  ;;  %v1105_v57 = vrot.slane %v1095_v51, 4 }
 0x209   : > { %v2184_v26 = vpop.eup %2183 }
 0x20a   : > { %v990_v60 = vadd.f32 1.0, %v2184_v26 }
 0x20b   : > { %v2186_v61 = vpop.eup %2185 }
 0x20c   : > { %2187 = vrcp.f32 %v990_v60  ;;  %v1000_v24 = vadd.f32 1.0, %v2186_v61 }
 0x20e   : > { %2189 = vrcp.f32 %v1000_v24 }
 0x217   : > { %v1048_v16 = vpop.f32.mrf.mxu0  ;;  %v1089_v23 = vpop.f32.mrf.mxu1 }
 0x218   : > { %v1097_v31 = vadd.f32 %v1095_v51, %v1048_v16 }
 0x219   : > { %v2188_v56 = vpop.eup %2187  ;;  %v1050_v1 = vpop.f32.mrf.mxu0 }
 0x21a   : > { %v1995_v21 = vpop.f32.mrf.mxu1  ;;  %v1004_v62 = vmul.f32 %v2188_v56, %v1003_v34  ;;  %v1821_v27 = vmul.f32 -1.442695, %v1097_v31  ;;  %v1107_v15 = vadd.f32 %v1105_v57, %v1050_v1 }
 0x21b   : > { %v1052_v19 = vpop.f32.mrf.mxu0  ;;  %v2190_v4 = vpop.eup %2189 }
 0x21c   : > { %v1092_v26 = vpop.f32.mrf.mxu1  ;;  %v1005_v60 = vadd.f32 %v1004_v62, %v985_v22  ;;  %2191 = vpow2.f32 %v1821_v27  ;;  %v1822_v63 = vmul.f32 -1.442695, %v1107_v15  ;;  %v1007_v13 = vsub.f32 1.0, %v2190_v4 }
 0x21d   : > { %v1053_v53 = vpop.f32.mrf.mxu0  ;;  %v1009_v51 = vmul.f32 %v2190_v4, %v2728_v5  ;;  %v1096_v5 = vunpack.c.h.bf16 %v1820_v59 }
 0x21e   : > { %v1996_v61 = vpop.f32.mrf.mxu1  ;;  %2193 = vtanh.f32 %v1005_v60  ;;  %v1825_v60 = vld [vmem:[%s2345_s14 + $0xc] sm:$0x3f] }
 0x21f   : > { %2195 = vpow2.f32 %v1822_v63  ;;  %v1210_v53 = vunpack.c.l.bf16 %v1825_v60 }
 0x229   : > { %v2192_v16 = vpop.eup %2191 }
 0x22a   : > { %v1101_v0 = vadd.f32 1.0, %v2192_v16 }
 0x22b   : > { %v2194_v21 = vpop.eup %2193 }
 0x22c   : > { %2197 = vrcp.f32 %v1101_v0  ;;  %v1008_v24 = vmul.f32 %v2194_v21, %v1007_v13  ;;  %v2196_v15 = vpop.eup %2195  ;;  %v1114_v0 = vadd.f32 %v2737_v58, %v1089_v23 }
 0x22d   : > { %v1111_v13 = vadd.f32 1.0, %v2196_v15 }
 0x22e   : > { %v2821_v34 = vadd.f32 %v1009_v51, %v1008_v24  ;;  %v1220_v51 = vrot.slane %v1210_v53, 4 }
 0x22f   : > { %2199 = vrcp.f32 %v1111_v13 }
 0x230   : > { %1823 = vst [vmem:[%s2340_s11 + $0x4] sm:$0xf] %v2821_v34  ;;  %v1128_v22 = vpack.c.bf16 %v2821_v34, %v2821_v34 }
 0x232   : > { %1162 = vmatmul.mubr.bf16.vlgmr.msra.gmra.mxu0 %v1128_v22  ;;  %2014 = vmatmul.mubr.bf16.vlgmr.msra.gmra.mxu1 %v1128_v22 }
 0x233   : > { %1241 = vmatpush1.bf16.msra.mxu0 %v2516_v29  ;;  %2018 = vmatpush3.bf16.msra.mxu1 %v2567_v37 }
 0x234   : > { %1242 = vmatprep.subr.bf16.mxu0 %v2521_v30  ;;  %2019 = vmatprep.subr.bf16.mxu1 %v3030_v18 }
 0x235   : > { %1272 = vmatprep.mubr.bf16.mxu0 %v3031_v25  ;;  %2033 = vmatprep.mubr.msk.bf16.mxu1 %vm2281_vm0, %v3030_v18 }
 0x237   : > { %1243 = vmatpush1.bf16.msra.mxu0 %v2534_v32  ;;  %2020 = vmatpush3.bf16.msra.mxu1 %v2586_v40 }
 0x238   : > { %1244 = vmatprep.subr.bf16.mxu0 %v2540_v33  ;;  %2021 = vmatprep.subr.bf16.mxu1 %v3030_v18 }
 0x239   : > { %v2198_v31 = vpop.eup %2197 }
 0x23a   : > { %v1115_v56 = vmul.f32 %v2198_v31, %v1114_v0 }
 0x23b   : > { %1245 = vmatpush1.bf16.msra.mxu0 %v2555_v35  ;;  %2022 = vmatpush3.bf16.msra.mxu1 %v2607_v43 }
 0x23c   : > { %v1116_v1 = vadd.f32 %v1115_v56, %v1096_v5  ;;  %1246 = vmatprep.subr.bf16.mxu0 %v2561_v36  ;;  %2023 = vmatprep.subr.bf16.mxu1 %v3030_v18  ;;  %v2200_v23 = vpop.eup %2199 }
 0x23d   : > { %v1118_v59 = vsub.f32 1.0, %v2200_v23  ;;  %v1120_v57 = vmul.f32 %v2200_v23, %v2772_v28  ;;  %v3054_v28 = vld [vmem:[#allocation16_spill] sm:$0xff]  ;;  %v1828_v23 = vld [vmem:[%s2355_s20 + $0x6] sm:$0x3f] }
 0x23e   : > { %2201 = vtanh.f32 %v1116_v1 }
 0x23f   : > { %1247 = vmatpush1.bf16.msra.mxu0 %v2574_v38  ;;  %2024 = vmatpush3.bf16.msra.mxu1 %v2626_v46 }
 0x240   : > { %1248 = vmatprep.subr.bf16.mxu0 %v2580_v39  ;;  %2025 = vmatprep.subr.bf16.mxu1 %v3030_v18 }
 0x243   : > { %1249 = vmatpush1.bf16.msra.mxu0 %v2595_v41  ;;  %2026 = vmatpush3.bf16.msra.mxu1 %v2645_v49 }
 0x244   : > { %1250 = vmatprep.subr.bf16.mxu0 %v2601_v42  ;;  %2027 = vmatprep.subr.bf16.mxu1 %v3030_v18 }
 0x247   : > { %1251 = vmatpush1.bf16.msra.mxu0 %v2614_v44  ;;  %2028 = vmatpush3.bf16.msra.mxu1 %v2661_v52 }
 0x248   : > { %1252 = vmatprep.subr.bf16.mxu0 %v2620_v45  ;;  %2029 = vmatprep.subr.bf16.mxu1 %v3030_v18 }
 0x24b   : > { %v2202_v62 = vpop.eup %2201  ;;  %1253 = vmatpush1.bf16.msra.mxu0 %v2633_v47  ;;  %2030 = vmatpush3.bf16.msra.mxu1 %v2671_v54 }
 0x24c   : > { %1254 = vmatprep.subr.bf16.mxu0 %v2639_v48  ;;  %2031 = vmatprep.subr.bf16.mxu1 %v3030_v18  ;;  %v1119_v27 = vmul.f32 %v2202_v62, %v1118_v59  ;;  %v1321_v62 = vunpack.c.l.bf16 %v1828_v23 }
 0x24e   : > { %v2860_v19 = vadd.f32 %v1120_v57, %v1119_v27 }
 0x24f   : > { %1255 = vmatpush1.bf16.msra.mxu0 %v2652_v50  ;;  %2032 = vmatpush3.bf16.msra.mxu1 %v2681_v55 }
 0x250   : > { %1824 = vst [vmem:[%s2350_s17 + $0x4] sm:$0xf] %v2860_v19  ;;  %v1239_v26 = vpack.c.bf16 %v2860_v19, %v2860_v19  ;;  %1355 = vmatprep.subr.bf16.mxu0 %v2367_v2  ;;  %2037 = vmatprep.subr.bf16.mxu1 %v3030_v18  ;;  %v3042_v2 = vld [vmem:[#allocation7_spill] sm:$0xff] }
 0x252   : > { %1273 = vmatmul.mubr.bf16.vlgmr.msra.gmra.mxu0 %v1239_v26  ;;  %2034 = vmatmul.mubr.bf16.vlgmr.msra.gmra.mxu1 %v1239_v26 }
 0x253   : > { %1356 = vmatpush1.bf16.msra.mxu0 %v2372_v3  ;;  %2038 = vmatpush3.bf16.msra.mxu1 %v2411_v11  ;;  %v3043_v3 = vld [vmem:[#allocation8_spill] sm:$0xff] }
 0x254   : > { %1357 = vmatprep.subr.bf16.mxu0 %v2380_v6  ;;  %2039 = vmatprep.subr.bf16.mxu1 %v3030_v18  ;;  %v3044_v6 = vld [vmem:[#allocation14_spill] sm:$0xff]  ;;  %v3049_v11 = vld [vmem:[#allocation12_spill] sm:$0xff] }
 0x255   : > { %1387 = vmatprep.mubr.bf16.mxu0 %v3031_v25  ;;  %2053 = vmatprep.mubr.msk.bf16.mxu1 %vm2281_vm0, %v3030_v18 }
 0x257   : > { %1358 = vmatpush1.bf16.msra.mxu0 %v2388_v7  ;;  %2040 = vmatpush3.bf16.msra.mxu1 %v2429_v14  ;;  %v3045_v7 = vld [vmem:[#allocation9_spill] sm:$0xff] }
 0x258   : > { %1359 = vmatprep.subr.bf16.mxu0 %v2394_v8  ;;  %2041 = vmatprep.subr.bf16.mxu1 %v3030_v18  ;;  %v3046_v8 = vld [vmem:[#allocation10_spill] sm:$0xff]  ;;  %v3051_v14 = vld [vmem:[#allocation13_spill] sm:$0xff] }
 0x25b   : > { %1360 = vmatpush1.bf16.msra.mxu0 %v2400_v9  ;;  %2042 = vmatpush3.bf16.msra.mxu1 %v2448_v17  ;;  %v3047_v9 = vld [vmem:[#allocation17_spill] sm:$0xff]  ;;  %v3052_v17 = vld [vmem:[#allocation15_spill] sm:$0xff] }
 0x25c   : > { %1361 = vmatprep.subr.bf16.mxu0 %v2406_v10  ;;  %2043 = vmatprep.subr.bf16.mxu1 %v3030_v18  ;;  %v3048_v10 = vld [vmem:[#allocation11_spill] sm:$0xff] }
 0x25f   : > { %1362 = vmatpush1.bf16.msra.mxu0 %v2417_v12  ;;  %2044 = vmatpush3.bf16.msra.mxu1 %v2467_v20  ;;  %v3050_v12 = vld [vmem:[#allocation18_spill] sm:$0xff]  ;;  %v3053_v20 = vld [vmem:[#allocation19_spill] sm:$0xff] }
 0x260   : > { %1363 = vmatprep.subr.bf16.mxu0 %v3042_v2  ;;  %2045 = vmatprep.subr.bf16.mxu1 %v3030_v18  ;;  %v1211_v2 = vunpack.c.h.bf16 %v1825_v60 }
 0x263   : > { %1364 = vmatpush1.bf16.msra.mxu0 %v3043_v3  ;;  %2046 = vmatpush3.bf16.msra.mxu1 %v3044_v6  ;;  %v3055_v3 = vld [vmem:[#allocation20_spill] sm:$0xff] }
 0x264   : > { %1365 = vmatprep.subr.bf16.mxu0 %v3045_v7  ;;  %2047 = vmatprep.subr.bf16.mxu1 %v3030_v18 }
 0x267   : > { %1366 = vmatpush1.bf16.msra.mxu0 %v3046_v8  ;;  %2048 = vmatpush3.bf16.msra.mxu1 %v3047_v9 }
 0x268   : > { %1367 = vmatprep.subr.bf16.mxu0 %v3048_v10  ;;  %2049 = vmatprep.subr.bf16.mxu1 %v3030_v18 }
 0x26b   : > { %1368 = vmatpush1.bf16.msra.mxu0 %v3049_v11  ;;  %2050 = vmatpush3.bf16.msra.mxu1 %v3050_v12 }
 0x26c   : > { %1369 = vmatprep.subr.bf16.mxu0 %v3051_v14  ;;  %2051 = vmatprep.subr.bf16.mxu1 %v3030_v18  ;;  %v1331_v14 = vrot.slane %v1321_v62, 4 }
 0x26f   : > { %1370 = vmatpush1.bf16.msra.mxu0 %v3052_v17  ;;  %2052 = vmatpush3.bf16.msra.mxu1 %v3053_v20 }
 0x270   : > { %1465 = vmatprep.subr.bf16.mxu0 %v3054_v28  ;;  %2057 = vmatprep.subr.bf16.mxu1 %v3030_v18 }
 0x2f2   : > { %v1163_v61 = vpop.f32.mrf.mxu0  ;;  %v1204_v63 = vpop.f32.mrf.mxu1 }
 0x2f3   : > { %v1212_v4 = vadd.f32 %v1210_v53, %v1163_v61  ;;  %v1229_v6 = vadd.f32 %v3055_v3, %v1204_v63 }
 0x2f4   : > { %v1165_v16 = vpop.f32.mrf.mxu0  ;;  %v2015_v21 = vpop.f32.mrf.mxu1 }
 0x2f5   : > { %v1826_v24 = vmul.f32 -1.442695, %v1212_v4  ;;  %v1222_v0 = vadd.f32 %v1220_v51, %v1165_v16 }
 0x2f6   : > { %v1167_v22 = vpop.f32.mrf.mxu0  ;;  %v1207_v15 = vpop.f32.mrf.mxu1 }
 0x2f7   : > { %2203 = vpow2.f32 %v1826_v24  ;;  %v1827_v31 = vmul.f32 -1.442695, %v1222_v0 }
 0x2f8   : > { %v1168_v13 = vpop.f32.mrf.mxu0  ;;  %v2016_v5 = vpop.f32.mrf.mxu1 }
 0x2f9   : > { %2205 = vpow2.f32 %v1827_v31  ;;  %v1322_v31 = vunpack.c.h.bf16 %v1828_v23  ;;  %v1463_v23 = vld [vmem:[%s2355_s20] sm:$0x3f] }
 0x304   : > { %v2204_v56 = vpop.eup %2203 }
 0x305   : > { %v1216_v1 = vadd.f32 1.0, %v2204_v56 }
 0x306   : > { %v2206_v59 = vpop.eup %2205 }
 0x307   : > { %2207 = vrcp.f32 %v1216_v1  ;;  %v1226_v27 = vadd.f32 1.0, %v2206_v59 }
 0x309   : > { %2209 = vrcp.f32 %v1226_v27 }
 0x312   : > { %v1274_v57 = vpop.f32.mrf.mxu0  ;;  %v1315_v26 = vpop.f32.mrf.mxu1 }
 0x313   : > { %v1323_v7 = vadd.f32 %v1321_v62, %v1274_v57  ;;  %v1340_v56 = vadd.f32 %v2737_v58, %v1315_v26  ;;  %v1546_v62 = vunpack.c.l.bf16 %v1463_v23 }
 0x314   : > { %v2208_v8 = vpop.eup %2207  ;;  %v1276_v9 = vpop.f32.mrf.mxu0 }
 0x315   : > { %v2035_v10 = vpop.f32.mrf.mxu1  ;;  %v1230_v11 = vmul.f32 %v2208_v8, %v1229_v6  ;;  %v1829_v12 = vmul.f32 -1.442695, %v1323_v7  ;;  %v1333_v4 = vadd.f32 %v1331_v14, %v1276_v9  ;;  %v1556_v14 = vrot.slane %v1546_v62, 4 }
 0x316   : > { %v1278_v17 = vpop.f32.mrf.mxu0  ;;  %v2210_v63 = vpop.eup %2209 }
 0x317   : > { %v1318_v20 = vpop.f32.mrf.mxu1  ;;  %v1231_v28 = vadd.f32 %v1230_v11, %v1211_v2  ;;  %2211 = vpow2.f32 %v1829_v12  ;;  %v1830_v60 = vmul.f32 -1.442695, %v1333_v4  ;;  %v1233_v24 = vsub.f32 1.0, %v2210_v63 }
 0x318   : > { %v1279_v53 = vpop.f32.mrf.mxu0  ;;  %v1235_v15 = vmul.f32 %v2210_v63, %v2821_v34 }
 0x319   : > { %v2036_v61 = vpop.f32.mrf.mxu1  ;;  %2213 = vtanh.f32 %v1231_v28 }
 0x31a   : > { %2215 = vpow2.f32 %v1830_v60 }
 0x324   : > { %v2212_v16 = vpop.eup %2211 }
 0x325   : > { %v1327_v21 = vadd.f32 1.0, %v2212_v16 }
 0x326   : > { %v2214_v51 = vpop.eup %2213 }
 0x327   : > { %2217 = vrcp.f32 %v1327_v21  ;;  %v1234_v22 = vmul.f32 %v2214_v51, %v1233_v24  ;;  %v2216_v0 = vpop.eup %2215 }
 0x328   : > { %v1337_v34 = vadd.f32 1.0, %v2216_v0 }
 0x329   : > { %v2909_v13 = vadd.f32 %v1235_v15, %v1234_v22 }
 0x32a   : > { %2219 = vrcp.f32 %v1337_v34  ;;  %v1547_v34 = vunpack.c.h.bf16 %v1463_v23 }
 0x32b   : > { %1831 = vst [vmem:[%s2340_s11 + $0x8] sm:$0xf] %v2909_v13  ;;  %v1354_v5 = vpack.c.bf16 %v2909_v13, %v2909_v13 }
 0x32d   : > { %1388 = vmatmul.mubr.bf16.vlgmr.msra.gmra.mxu0 %v1354_v5  ;;  %2054 = vmatmul.mubr.bf16.vlgmr.msra.gmra.mxu1 %v1354_v5 }
 0x32e   : > { %1466 = vmatpush1.bf16.msra.mxu0 %v2516_v29  ;;  %2058 = vmatpush3.bf16.msra.mxu1 %v2567_v37 }
 0x32f   : > { %1467 = vmatprep.subr.bf16.mxu0 %v2521_v30  ;;  %2059 = vmatprep.subr.bf16.mxu1 %v3030_v18 }
 0x330   : > { %1497 = vmatprep.mubr.bf16.mxu0 %v3031_v25  ;;  %2073 = vmatprep.mubr.msk.bf16.mxu1 %vm2281_vm0, %v3030_v18 }
 0x332   : > { %1468 = vmatpush1.bf16.msra.mxu0 %v2534_v32  ;;  %2060 = vmatpush3.bf16.msra.mxu1 %v2586_v40 }
 0x333   : > { %1469 = vmatprep.subr.bf16.mxu0 %v2540_v33  ;;  %2061 = vmatprep.subr.bf16.mxu1 %v3030_v18 }
 0x334   : > { %v2218_v29 = vpop.eup %2217 }
 0x335   : > { %v1341_v30 = vmul.f32 %v2218_v29, %v1340_v56 }
 0x336   : > { %1470 = vmatpush1.bf16.msra.mxu0 %v2555_v35  ;;  %2062 = vmatpush3.bf16.msra.mxu1 %v2607_v43 }
 0x337   : > { %v1342_v37 = vadd.f32 %v1341_v30, %v1322_v31  ;;  %1471 = vmatprep.subr.bf16.mxu0 %v2561_v36  ;;  %2063 = vmatprep.subr.bf16.mxu1 %v3030_v18  ;;  %v2220_v32 = vpop.eup %2219 }
 0x338   : > { %v1344_v33 = vsub.f32 1.0, %v2220_v32 }
 0x339   : > { %2221 = vtanh.f32 %v1342_v37 }
 0x33a   : > { %1472 = vmatpush1.bf16.msra.mxu0 %v2574_v38  ;;  %2064 = vmatpush3.bf16.msra.mxu1 %v2626_v46  ;;  %v1346_v38 = vmul.f32 %v2220_v32, %v2860_v19 }
 0x33b   : > { %1473 = vmatprep.subr.bf16.mxu0 %v2580_v39  ;;  %2065 = vmatprep.subr.bf16.mxu1 %v3030_v18 }
 0x33e   : > { %1474 = vmatpush1.bf16.msra.mxu0 %v2595_v41  ;;  %2066 = vmatpush3.bf16.msra.mxu1 %v2645_v49  ;;  %v1833_v41 = vld [vmem:[%s2345_s14 + $0x12] sm:$0x3f] }
 0x33f   : > { %1475 = vmatprep.subr.bf16.mxu0 %v2601_v42  ;;  %2067 = vmatprep.subr.bf16.mxu1 %v3030_v18  ;;  %v1436_v42 = vunpack.c.l.bf16 %v1833_v41  ;;  %v1437_v2 = vunpack.c.h.bf16 %v1833_v41 }
 0x341   : > { %v1446_v49 = vrot.slane %v1436_v42, 4 }
 0x342   : > { %1476 = vmatpush1.bf16.msra.mxu0 %v2614_v44  ;;  %2068 = vmatpush3.bf16.msra.mxu1 %v2661_v52 }
 0x343   : > { %1477 = vmatprep.subr.bf16.mxu0 %v2620_v45  ;;  %2069 = vmatprep.subr.bf16.mxu1 %v3030_v18 }
 0x346   : > { %v2222_v35 = vpop.eup %2221  ;;  %1478 = vmatpush1.bf16.msra.mxu0 %v2633_v47  ;;  %2070 = vmatpush3.bf16.msra.mxu1 %v2671_v54 }
 0x347   : > { %1479 = vmatprep.subr.bf16.mxu0 %v2639_v48  ;;  %2071 = vmatprep.subr.bf16.mxu1 %v3030_v18  ;;  %v1345_v36 = vmul.f32 %v2222_v35, %v1344_v33 }
 0x349   : > { %v2948_v39 = vadd.f32 %v1346_v38, %v1345_v36 }
 0x34a   : > { %1480 = vmatpush1.bf16.msra.mxu0 %v2652_v50  ;;  %2072 = vmatpush3.bf16.msra.mxu1 %v2681_v55 }
 0x34b   : > { %1832 = vst [vmem:[%s2350_s17 + $0x8] sm:$0xf] %v2948_v39  ;;  %v1464_v40 = vpack.c.bf16 %v2948_v39, %v2948_v39 }
 0x34d   : > { %1498 = vmatmul.mubr.bf16.vlgmr.msra.gmra.mxu0 %v1464_v40  ;;  %2074 = vmatmul.mubr.bf16.vlgmr.msra.gmra.mxu1 %v1464_v40 }
 0x3ed   : > { %v1389_v43 = vpop.f32.mrf.mxu0  ;;  %v1430_v44 = vpop.f32.mrf.mxu1 }
 0x3ee   : > { %v1438_v45 = vadd.f32 %v1436_v42, %v1389_v43  ;;  %v1455_v6 = vadd.f32 %v3055_v3, %v1430_v44 }
 0x3ef   : > { %v1391_v46 = vpop.f32.mrf.mxu0  ;;  %v2055_v47 = vpop.f32.mrf.mxu1 }
 0x3f0   : > { %v1834_v48 = vmul.f32 -1.442695, %v1438_v45  ;;  %v1448_v18 = vadd.f32 %v1446_v49, %v1391_v46 }
 0x3f1   : > { %v1393_v50 = vpop.f32.mrf.mxu0  ;;  %v1433_v52 = vpop.f32.mrf.mxu1 }
 0x3f2   : > { %2223 = vpow2.f32 %v1834_v48  ;;  %v1835_v25 = vmul.f32 -1.442695, %v1448_v18 }
 0x3f3   : > { %v1394_v54 = vpop.f32.mrf.mxu0  ;;  %v2056_v55 = vpop.f32.mrf.mxu1 }
 0x3f4   : > { %2225 = vpow2.f32 %v1835_v25 }
 0x3ff   : > { %v2224_v19 = vpop.eup %2223 }
 0x400   : > { %v1442_v1 = vadd.f32 1.0, %v2224_v19 }
 0x401   : > { %v2226_v59 = vpop.eup %2225 }
 0x402   : > { %2227 = vrcp.f32 %v1442_v1  ;;  %v1452_v27 = vadd.f32 1.0, %v2226_v59 }
 0x404   : > { %2229 = vrcp.f32 %v1452_v27 }
 0x40d   : > { %v1499_v57 = vpop.f32.mrf.mxu0  ;;  %v1540_v26 = vpop.f32.mrf.mxu1 }
 0x40e   : > { %v1548_v7 = vadd.f32 %v1546_v62, %v1499_v57  ;;  %v1565_v31 = vadd.f32 %v2737_v58, %v1540_v26 }
 0x40f   : > { %v2228_v8 = vpop.eup %2227  ;;  %v1501_v9 = vpop.f32.mrf.mxu0 }
 0x410   : > { %v2075_v10 = vpop.f32.mrf.mxu1  ;;  %v1456_v11 = vmul.f32 %v2228_v8, %v1455_v6  ;;  %v1836_v12 = vmul.f32 -1.442695, %v1548_v7  ;;  %v1558_v4 = vadd.f32 %v1556_v14, %v1501_v9 }
 0x411   : > { %v1503_v17 = vpop.f32.mrf.mxu0  ;;  %v2230_v3 = vpop.eup %2229 }
 0x412   : > { %v1543_v20 = vpop.f32.mrf.mxu1  ;;  %v1457_v28 = vadd.f32 %v1456_v11, %v1437_v2  ;;  %2231 = vpow2.f32 %v1836_v12  ;;  %v1837_v60 = vmul.f32 -1.442695, %v1558_v4  ;;  %v1459_v16 = vsub.f32 1.0, %v2230_v3 }
 0x413   : > { %v1504_v53 = vpop.f32.mrf.mxu0  ;;  %v1461_v22 = vmul.f32 %v2230_v3, %v2909_v13 }
 0x414   : > { %v2076_v61 = vpop.f32.mrf.mxu1  ;;  %2233 = vtanh.f32 %v1457_v28 }
 0x415   : > { %2235 = vpow2.f32 %v1837_v60 }
 0x41f   : > { %v2232_v63 = vpop.eup %2231 }
 0x420   : > { %v1552_v21 = vadd.f32 1.0, %v2232_v63 }
 0x421   : > { %v2234_v24 = vpop.eup %2233 }
 0x422   : > { %v1460_v51 = vmul.f32 %v2234_v24, %v1459_v16  ;;  %2237 = vrcp.f32 %v1552_v21  ;;  %v2236_v5 = vpop.eup %2235 }
 0x423   : > { %v1562_v0 = vadd.f32 1.0, %v2236_v5 }
 0x424   : > { %v1462_v15 = vadd.f32 %v1461_v22, %v1460_v51 }
 0x425   : > { %2239 = vrcp.f32 %v1562_v0 }
 0x426   : > { %1838 = vst [vmem:[%s2340_s11 + $0xc] sm:$0xf] %v1462_v15  ;;  %1577 = vst [vmem:[#allocation2] sm:$0xf] %v1462_v15 }
 0x42f   : > { %v2238_v56 = vpop.eup %2237 }
 0x430   : > { %v1566_v29 = vmul.f32 %v2238_v56, %v1565_v31 }
 0x432   : > { %v1567_v30 = vadd.f32 %v1566_v29, %v1547_v34  ;;  %v2240_v37 = vpop.eup %2239 }
 0x433   : > { %v1569_v32 = vsub.f32 1.0, %v2240_v37  ;;  %v1571_v13 = vmul.f32 %v2240_v37, %v2948_v39 }
 0x434   : > { %2241 = vtanh.f32 %v1567_v30 }
 0x441   : > { %v2242_v33 = vpop.eup %2241 }
 0x442   : > { %v1570_v35 = vmul.f32 %v2242_v33, %v1569_v32  ;;  %1582 = sbr.rel (%p1840_p6) target bundleno = 1096 (0x448), region = 48 }
 0x444   : > { %v1572_v36 = vadd.f32 %v1571_v13, %v1570_v35 }
 0x446   : > { %1839 = vst [vmem:[%s2350_s17 + $0xc] sm:$0xf] %v1572_v36  ;;  %1578 = vst [vmem:[#allocation3] sm:$0xf] %v1572_v36 }
 0x447   : > { %1583 = vst [vmem:[#allocation4] sm:$0xf] %v1462_v15  ;;  %1585 = vst [vmem:[#allocation4 + $0x4] sm:$0xf] %v1572_v36 }
 0x448 PF: > { %p2083_p7 = scmp.eq.s32.totalorder %s2331_s25, 1  ;;  %s2282_s11 = smov [#allocation4]  }
 0x449   : > { %s1610_s14 = sshll.u32 %s2282_s11, 4  ;;  %s1611_s14 = int_to_ptr.vmem [resolvable:$true] %s1610_s14 }
 0x44a   : > { %s2243_s20 = scalar_lea.vmem %s1611_s14, 128  ;;  %p2250_p11 = scmp.lt.s32.totalorder %s1611_s14, %s1611_s14 }
 0x44b   : > { %p2244_p8 = scmp.ne.s32.totalorder %s1611_s14, %s2243_s20  ;;  %p2251_p12 = scmp.lt.s32.totalorder %s2243_s20, %s2243_s20 }
 0x44d   : > { %p2245_p9 = pnand %p2244_p8, %p2083_p7  ;;  %p2252_p13 = por %p2251_p12, %p2250_p11 }
 0x44f   : > { %p2246_p10 = pneg %p2245_p9 }
 0x451   : > { %p2253_p0 = pnand %p2252_p13, %p2246_p10 }
 0x453   : > { %2256 = shalt.err (!%p2253_p0)
}
 0x454   : > { %s2283_s17 = smov 64   ;;  %s2284_s23 = smov 4  }
 0x455   : > { %2080 = dma.vmem_to_hbm [thread:$0]  (%p2083_p7), %s1611_s14, 128, %s2987_s7, [#allocation5], %s2283_s17, %s2283_s17, %s2284_s23  }
 0x456   : > { %2272 = dma.done.wait (%p2083_p7), [#allocation5], 128  }
 0x457   : > { %2274 = vsyncadd (%p2083_p7), [#allocation5], 4294967168 }
 0x458 PF: > { %s19_s24 = sadd.s32 1, %s2277_s24  }
 0x459   : > { %p16_p1 = scmp.ge.s32.totalorder %s19_s24, 4  }
 0x45b   :  { %18 = sbr.rel (!%p16_p1) target bundleno = 1 (0x1), region = 118 }
 0x460   :  { %1642 = vsyncpa [#allocation5], 1 }
 0x461   :  { %1644 = vsyncpa [#allocation5 + $0x1], 1 }

</bundles_post_ra>
